<compile_context>
chip_gen: v7x
topology: tpu7x:2x2x1
jax: 0.10.0
libtpu: 0.0.40
codegen_flags: <defaults>
</compile_context>

<pallas_src>
import functools
import numpy as np
import jax
import jax.numpy as jnp
from jax.experimental import pallas as pl
from jax.experimental.pallas import tpu as pltpu


_NEG_BIG = -1e30   # stands in for -inf on padded columns (safe in bf16 too)


def _cr_rank_kernel(anchor_ref, pos_rows_ref, pos_t_ref, masks_ref, taus_ref,
                    rowvalid_ref, colvalid_ref, out_ref, *, use_bf16):
    """Per row-tile ContrastiveRanking forward math.

    anchor_ref   : (TM, Hp)   f32   anchor rows of this tile (feature-padded)
    pos_rows_ref : (TM, Hp)   f32   matching rows of l_proto[train_mask] (for l_pos)
    pos_t_ref    : (Hp, Mc)   bf16  pre-transposed l_proto[train_mask] (resident MXU RHS)
    masks_ref    : (TM, R)    f32   per-rank row masks masks[i][train_mask, train_mask]
    taus_ref     : (TM, R)    f32   per-rank dynamic taus (1.0 on padded rows)
    rowvalid_ref : (TM, 1)    f32   1.0 for real rows, 0.0 for padded rows
    colvalid_ref : (1, Mc)    f32   1.0 for real columns, 0.0 for padded columns
    out_ref      : (1, 8, 128) f32  per-tile partials: row 0 lanes[:R] = sum(-log(sum_pos)
                                    over valid rows), row 1 lanes[:R] = count of valid rows
    """
    a = anchor_ref[...]                                    # (TM, Hp)
    p_rows = pos_rows_ref[...]                             # (TM, Hp)
    tm = a.shape[0]
    n_ranks = masks_ref.shape[1]

    # l_pos = einsum('nc,nc->n') -- kept in f32.
    l_pos = jnp.sum(a * p_rows, axis=1, keepdims=True)     # (TM, 1)

    # l_class_pos = anchor @ pos.T on the MXU: bf16 inputs, contraction on the
    # RHS sublane axis (pre-transposed), f32 accumulation.
    lcp = jax.lax.dot_general(
        a.astype(jnp.bfloat16), pos_t_ref[...],
        dimension_numbers=(((1,), (0,)), ((), ())),
        preferred_element_type=jnp.float32)                # (TM, Mc)

    # Padded columns behave like -inf: contribute 0 to every exp-sum.
    colvalid = colvalid_ref[...] > 0.5                     # (1, Mc)
    lcp = jnp.where(colvalid, lcp, _NEG_BIG)

    # Hoisted: tau > 0  =>  max(lcp / tau) == max(lcp) / tau.
    row_max = jnp.max(lcp, axis=1, keepdims=True)          # (TM, 1)
    lcp_e = lcp.astype(jnp.bfloat16) if use_bf16 else lcp

    masks_all = masks_ref[...]                             # load once
    taus_all = taus_ref[...]
    rowvalid = rowvalid_ref[...] > 0.5                     # (TM, 1)

    # Row-level view of the reference per rank i:
    #   row finite  <=> rm_i OR not(any earlier rank masked it)  (keep)
    #   row all -inf (NaN softmax in torch) otherwise -> dropped by the > 1e-7 filter.
    cum = jnp.zeros((tm, 1), jnp.bool_)     # rows already set to -inf in l_neg
    nl_parts = []
    cnt_parts = []
    for i in range(n_ranks):                # n_ranks static & small -> unrolled
        rm = masks_all[:, i:i + 1] > 0.5                   # (TM, 1) bool
        inv_tau = 1.0 / taus_all[:, i:i + 1]               # exact; (TM,1) off the hot path

        m = row_max * inv_tau
        if i == 0:
            lpos_s = l_pos * inv_tau
            m = jnp.maximum(m, lpos_s)

        if use_bf16:
            # Same (bf16-rounded) m for numerator and denominator terms.
            m_r = m.astype(jnp.bfloat16).astype(jnp.float32)
            e = jnp.exp(lcp_e * inv_tau.astype(jnp.bfloat16) - m_r.astype(jnp.bfloat16))
            s = jnp.sum(e.astype(jnp.float32), axis=1, keepdims=True)   # (TM, 1)
        else:
            m_r = m
            e = jnp.exp(lcp_e * inv_tau - m_r)             # ONE (TM, Mc) exp per rank
            s = jnp.sum(e, axis=1, keepdims=True)

        if i == 0:                          # cat([l_pos, l_class_pos_cur]) at rank 0
            e_lp = jnp.exp(lpos_s - m_r)
            s_pos = jnp.where(rm, s, 0.0) + e_lp
            denom = s + e_lp
        else:
            s_pos = jnp.where(rm, s, 0.0)
            denom = s
        sum_pos = s_pos / denom                            # exact divide, (TM,1)

        keep = jnp.logical_or(rm, jnp.logical_not(cum))    # finite row in the reference
        valid = jnp.logical_and(keep, sum_pos > 1e-7)      # NaN / zero rows drop out
        valid = jnp.logical_and(valid, rowvalid)           # drop padded rows
        safe = jnp.where(valid, sum_pos, 1.0)
        nl = jnp.where(valid, -jnp.log(safe), 0.0)

        nl_parts.append(jnp.sum(nl, keepdims=True))                        # (1, 1)
        cnt_parts.append(jnp.sum(valid.astype(jnp.float32), keepdims=True))
        cum = jnp.logical_or(cum, rm)       # l_neg[mask] = -inf persists to later ranks

    # Assemble one lane-dense (8, 128) output tile of partial sums.
    rowi = jax.lax.broadcasted_iota(jnp.int32, (8, 128), 0)
    coli = jax.lax.broadcasted_iota(jnp.int32, (8, 128), 1)
    tile = jnp.zeros((8, 128), jnp.float32)
    for i in range(n_ranks):
        tile = tile + jnp.where(jnp.logical_and(rowi == 0, coli == i), nl_parts[i], 0.0)
        tile = tile + jnp.where(jnp.logical_and(rowi == 1, coli == i), cnt_parts[i], 0.0)
    out_ref[...] = tile.reshape(1, 8, 128)


def _round_up(x, m):
    return ((x + m - 1) // m) * m


def _device_kind():
    try:
        return jax.devices()[0].device_kind.lower()
    except Exception:
        return ""


def _select_tile(M, Hp, Mc, R, use_bf16, want_two_tiles):
    """VMEM-budget-aware row-tile + vmem_limit selection (v5e/v6e/v7x)."""
    try:
        cap = int(pltpu.get_tpu_info().vmem_capacity_bytes)
    except Exception:
        cap = 64 * 1024 * 1024          # conservative (v7x per-TC)
    budget = (cap * 7) // 10
    m8 = _round_up(max(M, 1), 8)
    cap_tm = 8                          # no point tiling far beyond the problem size
    while cap_tm < min(512, m8):
        cap_tm *= 2
    tm, need = 8, 0
    for cand in (512, 256, 128, 64, 32, 16, 8):
        if cand > cap_tm:
            continue
        resident = Hp * Mc * 2                                   # bf16 pos^T, 1 buffer
        tiles = 2 * (cand * Hp * 4 * 2 + cand * R * 4 * 2 + cand * 4 + Mc * 4)
        lcp_b = cand * Mc * 4                                    # f32 MXU accumulation
        exp_b = cand * Mc * (2 if use_bf16 else 4)               # exp transient / bf16 copy
        need = resident + tiles + lcp_b + 2 * exp_b + 2 * 8 * 128 * 4
        tm = cand
        if need <= budget:
            break
    if want_two_tiles:                  # keep both v7x TensorCores busy
        while tm > 8 and -(-M // tm) < 2:
            tm //= 2
    vmem_limit = int(min((cap * 9) // 10, max((need * 5) // 4, 16 * 1024 * 1024)))
    return tm, vmem_limit


def contrastive_ranking_loss(anchor, pos, row_masks, taus):
    """Row-tiled parallel grid; tiny per-rank finalize done in XLA."""
    M, H = anchor.shape
    R = row_masks.shape[1]
    assert R <= 126, "n_ranks must fit in one output lane row"

    kind = _device_kind()
    use_bf16 = ("v6" in kind) or ("v7" in kind) or ("7x" in kind)   # bf16 VPU/EUP chips
    is_v7 = ("v7" in kind) or ("7x" in kind)

    Hp = _round_up(H, 128)              # lane-dense feature axis (exact zero-padding)
    Mc = _round_up(M, 128)              # lane-dense column axis of l_class_pos
    tm, vmem_limit = _select_tile(M, Hp, Mc, R, use_bf16, is_v7)
    Mr = _round_up(M, tm)               # row padding to a whole number of tiles
    grid_n = Mr // tm

    anchor = anchor.astype(jnp.float32)
    pos = pos.astype(jnp.float32)
    if Hp != H:
        anchor = jnp.pad(anchor, ((0, 0), (0, Hp - H)))
        pos = jnp.pad(pos, ((0, 0), (0, Hp - H)))

    anchor_p = jnp.pad(anchor, ((0, Mr - M), (0, 0)))
    pos_rows_p = jnp.pad(pos, ((0, Mr - M), (0, 0)))
    pos_t = jnp.pad(pos, ((0, Mc - M), (0, 0))).T.astype(jnp.bfloat16)       # (Hp, Mc)
    masks_p = jnp.pad(row_masks.astype(jnp.float32), ((0, Mr - M), (0, 0)))
    taus_p = jnp.pad(taus.astype(jnp.float32), ((0, Mr - M), (0, 0)),
                     constant_values=1.0)
    rowvalid = (jnp.arange(Mr) < M).astype(jnp.float32).reshape(Mr, 1)
    colvalid = (jnp.arange(Mc) < M).astype(jnp.float32).reshape(1, Mc)

    kernel = functools.partial(_cr_rank_kernel, use_bf16=use_bf16)

    cost = pl.CostEstimate(
        flops=2 * Mr * Mc * Hp + 6 * R * Mr * Mc,
        transcendentals=R * Mr * Mc,
        bytes_accessed=(2 * Mr * Hp * 4 + grid_n * Hp * Mc * 2
                        + 2 * Mr * R * 4 + grid_n * 8 * 128 * 4))

    def build(pos_t_spec):
        return pl.pallas_call(
            kernel,
            out_shape=jax.ShapeDtypeStruct((grid_n, 8, 128), jnp.float32),
            grid=(grid_n,),
            in_specs=[
                pl.BlockSpec((tm, Hp), lambda i: (i, 0)),   # anchor row tile
                pl.BlockSpec((tm, Hp), lambda i: (i, 0)),   # matching pos rows (l_pos)
                pos_t_spec,                                  # resident bf16 pos^T
                pl.BlockSpec((tm, R), lambda i: (i, 0)),    # per-rank row masks
                pl.BlockSpec((tm, R), lambda i: (i, 0)),    # per-rank taus
                pl.BlockSpec((tm, 1), lambda i: (i, 0)),    # row validity (padding)
                pl.BlockSpec((1, Mc), lambda i: (0, 0)),    # column validity (padding)
            ],
            out_specs=pl.BlockSpec((1, 8, 128), lambda i: (i, 0, 0)),
            compiler_params=pltpu.CompilerParams(
                dimension_semantics=("parallel",),
                vmem_limit_bytes=vmem_limit),
            cost_estimate=cost,
        )

    args = (anchor_p, pos_rows_p, pos_t, masks_p, taus_p, rowvalid, colvalid)
    try:
        # Constant index_map -> single buffer for the biggest VMEM consumer.
        spec_buf1 = pl.BlockSpec((Hp, Mc), lambda i: (0, 0),
                                 pipeline_mode=pl.Buffered(1))
        parts = build(spec_buf1)(*args)
    except Exception:
        # Fallback if this JAX version rejects buffer_count=1.
        spec_def = pl.BlockSpec((Hp, Mc), lambda i: (0, 0))
        parts = build(spec_def)(*args)

    # Per-rank: mean of -log(sum_pos) over valid rows (0.0 if none); average over ranks.
    nl = jnp.sum(parts[:, 0, :R], axis=0)                  # (R,)
    ct = jnp.sum(parts[:, 1, :R], axis=0)                  # (R,)
    per_rank = jnp.where(ct > 0.0, nl / jnp.maximum(ct, 1.0), 0.0)
    return jnp.sum(per_rank) / jnp.float32(R)


def _reference_loss(anchor, pos, row_masks, taus):
    """Pure-numpy mirror of the PyTorch forward (for correctness check)."""
    with np.errstate(invalid="ignore", over="ignore", divide="ignore"):
        l_pos = np.sum(anchor * pos, axis=1, keepdims=True)
        l_class_pos = anchor @ pos.T
        l_neg = l_class_pos.copy()
        total = 0.0
        n_ranks = row_masks.shape[1]
        for i in range(n_ranks):
            rm = row_masks[:, i].astype(bool)
            tau = taus[:, i:i + 1]
            l_neg[rm, :] = -np.inf
            l_cp = l_class_pos.copy()
            l_cp[~rm, :] = -np.inf
            pos_part = np.concatenate([l_pos, l_cp], axis=1) if i == 0 else l_cp
            logits = np.concatenate([pos_part, l_neg], axis=1) / tau
            m = np.max(logits, axis=1, keepdims=True)
            e = np.exp(logits - m)
            soft = e / np.sum(e, axis=1, keepdims=True)
            sum_pos = soft[:, :pos_part.shape[1]].sum(1)
            valid = sum_pos > 1e-7
            loss_i = float(np.mean(-np.log(sum_pos[valid]))) if valid.sum() > 0 else 0.0
            total += loss_i
        return total / float(n_ranks)


if __name__ == "__main__":
    key = jax.random.PRNGKey(0)
    k_anchor, k_proto, k_w, k_b = jax.random.split(key, 4)

    # ---- "opt" hyperparameters (chosen so only the sum_in_log path is exercised) ----
    nclasses = 4
    L = 16                    # number of labeled nodes / prototypes
    n_fea = 16
    n_hid = 32
    n_sim_classes = 3
    min_tau, max_tau = 0.1, 0.5
    similarity_threshold = 0.3   # > 0 -> use_all_ranked_classes_above_threshold
    # do_sum_in_log=True, mixed_out_in=False, use_same_and_similar_class=False,
    # one_loss_per_rank=False
    # TODO(synk): sum_out_log is referenced but not defined in the reference source;
    # the flags above guarantee only the sum_in_log path is used.

    labels = (np.arange(L) % nclasses).astype(np.int64)        # (L,)

    # ---- class_sims_idx (deterministic synthetic similarity tables) ----
    sim_vals = np.array([1.0, 0.7, 0.4, 0.15], dtype=np.float32)
    sim_idx = {
        0: np.array([-1, 0, 1, 2], dtype=np.int64),
        1: np.array([1, 0, 2, 3], dtype=np.int64),
        2: np.array([0, 3, 1, 2], dtype=np.int64),
        3: np.array([2, 1, 0, 3], dtype=np.int64),
    }
    class_sims_idx = {c: {"sim_class_idx2indices": sim_idx[c],
                          "sim_class_val": sim_vals.copy()} for c in range(nclasses)}

    # ---- __init__ precomputation (numpy glue, mirrors the PyTorch constructor) ----
    K = len(class_sims_idx[0]["sim_class_idx2indices"])
    similar_labels = np.zeros((L, K), dtype=np.int64)
    class_sims = np.zeros((L, K), dtype=np.float32)
    below_threshold = np.zeros((L, K), dtype=bool)
    for i, lab in enumerate(labels):
        similar_labels[i, :] = class_sims_idx[int(lab)]["sim_class_idx2indices"] + 1
        class_sims[i, :] = class_sims_idx[int(lab)]["sim_class_val"]
        below_threshold[i, :] = class_sims_idx[int(lab)]["sim_class_val"] >= similarity_threshold
    at_least = below_threshold.sum(axis=0) > 0
    similar_labels = similar_labels[:, at_least][:, :n_sim_classes]
    class_sims = class_sims[:, :n_sim_classes]

    full_masks, dynamic_taus = [], []
    for i in range(similar_labels.shape[1]):
        mask = (labels[:, None] == similar_labels[None, :, i]).T          # (L, L)
        full_masks.append(mask)
        dynamic_taus.append(min_tau + (1.0 - class_sims[:, i]) * (max_tau - min_tau))

    # linear_layer = nn.Linear(n_fea, n_hid).double(); l_proto = linear_layer(l_proto)
    bound = 1.0 / np.sqrt(n_fea)
    W = np.asarray(jax.random.uniform(k_w, (n_hid, n_fea), minval=-bound, maxval=bound),
                   dtype=np.float64)
    b = np.asarray(jax.random.uniform(k_b, (n_hid,), minval=-bound, maxval=bound),
                   dtype=np.float64)
    l_proto_in = np.asarray(jax.random.normal(k_proto, (L, n_fea)), dtype=np.float64)
    l_proto = l_proto_in @ W.T + b                                         # (L, n_hid) f64

    # ---- forward inputs ----
    M = 8
    train_mask = np.zeros((L,), dtype=bool)
    train_mask[:M] = True
    train_idx = np.nonzero(train_mask)[0]

    anchor = (np.asarray(jax.random.normal(k_anchor, (M, n_hid)), dtype=np.float32) * 0.1)
    pos = l_proto[train_mask].astype(np.float32)                           # (M, n_hid)

    n_ranks = similar_labels.shape[1]
    # masks[i][train_mask, train_mask] in PyTorch == diagonal at selected indices
    row_masks = np.stack([full_masks[i][train_idx, train_idx] for i in range(n_ranks)],
                         axis=1).astype(np.float32)                        # (M, n_ranks)
    taus = np.stack([dynamic_taus[i].reshape(-1)[train_mask] for i in range(n_ranks)],
                    axis=1).astype(np.float32)                             # (M, n_ranks)

    loss = contrastive_ranking_loss(jnp.asarray(anchor), jnp.asarray(pos),
                                    jnp.asarray(row_masks), jnp.asarray(taus))
    loss = jax.block_until_ready(loss)

    ref = _reference_loss(anchor, pos, row_masks, taus)
    np.testing.assert_allclose(float(loss), float(ref), rtol=5e-2, atol=1e-3)
    print("KERNEL_OK")
</pallas_src>

<mosaic_0001>
module attributes {stable_mosaic.version = 11 : i64} {
  func.func @_cr_rank_kernel(%arg0: i32, %arg1: memref<8x128xf32, #tpu.memory_space<vmem>>, %arg2: memref<8x128xf32, #tpu.memory_space<vmem>>, %arg3: memref<128x128xbf16, #tpu.memory_space<vmem>>, %arg4: memref<8x3xf32, #tpu.memory_space<vmem>>, %arg5: memref<8x3xf32, #tpu.memory_space<vmem>>, %arg6: memref<8x1xf32, #tpu.memory_space<vmem>>, %arg7: memref<1x128xf32, #tpu.memory_space<vmem>>, %arg8: memref<1x8x128xf32, #tpu.memory_space<vmem>>) attributes {dimension_semantics = [#tpu.dimension_semantics<parallel>], iteration_bounds = array<i64: 1>, scalar_prefetch = 0 : i64, scratch_operands = 0 : i64, tpu.core_type = #tpu.core_type<tc>, window_params = [{transform_indices = @transform_0, window_bounds = array<i64: 8, 128>}, {transform_indices = @transform_1, window_bounds = array<i64: 8, 128>}, {pipeline_mode = #tpu.pipeline_mode<synchronous>, transform_indices = @transform_2, window_bounds = array<i64: 128, 128>}, {transform_indices = @transform_3, window_bounds = array<i64: 8, 3>}, {transform_indices = @transform_4, window_bounds = array<i64: 8, 3>}, {transform_indices = @transform_5, window_bounds = array<i64: 8, 1>}, {pipeline_mode = #tpu.pipeline_mode<synchronous>, transform_indices = @transform_6, window_bounds = array<i64: 1, 128>}, {transform_indices = @transform_7, window_bounds = array<i64: 1, 8, 128>}]} {
    %c0 = arith.constant 0 : index
    %c0_0 = arith.constant 0 : index
    %0 = vector.load %arg1[%c0, %c0_0] : memref<8x128xf32, #tpu.memory_space<vmem>>, vector<8x128xf32>
    %c0_1 = arith.constant 0 : index
    %c0_2 = arith.constant 0 : index
    %1 = vector.load %arg2[%c0_1, %c0_2] : memref<8x128xf32, #tpu.memory_space<vmem>>, vector<8x128xf32>
    %2 = arith.mulf %0, %1 : vector<8x128xf32>
    %cst = arith.constant dense<0.000000e+00> : vector<8xf32>
    %3 = vector.multi_reduction <add>, %2, %cst [1] : vector<8x128xf32> to vector<8xf32>
    %4 = vector.shape_cast %3 : vector<8xf32> to vector<8x1xf32>
    %5 = arith.truncf %0 : vector<8x128xf32> to vector<8x128xbf16>
    %c0_3 = arith.constant 0 : index
    %c0_4 = arith.constant 0 : index
    %6 = vector.load %arg3[%c0_3, %c0_4] : memref<128x128xbf16, #tpu.memory_space<vmem>>, vector<128x128xbf16>
    %cst_5 = arith.constant dense<0.000000e+00> : vector<8x128xf32>
    %7 = tpu.matmul %5, %6, %cst_5 {dimension_numbers = #tpu.dot_dimension_numbers<[1], [0], [0], [1], [0, 0, 1, 1], [], []>} : vector<8x128xbf16>, vector<128x128xbf16>, vector<8x128xf32> -> vector<8x128xf32>
    %c0_6 = arith.constant 0 : index
    %c0_7 = arith.constant 0 : index
    %8 = vector.load %arg7[%c0_6, %c0_7] : memref<1x128xf32, #tpu.memory_space<vmem>>, vector<1x128xf32>
    %cst_8 = arith.constant 5.000000e-01 : f32
    %9 = vector.broadcast %cst_8 : f32 to vector<1x128xf32>
    %10 = arith.cmpf ogt, %8, %9 : vector<1x128xf32>
    %cst_9 = arith.constant -1.000000e+30 : f32
    %11 = vector.shape_cast %10 : vector<1x128xi1> to vector<1x128xi1>
    %12 = vector.broadcast %11 : vector<1x128xi1> to vector<8x128xi1>
    %13 = vector.broadcast %cst_9 : f32 to vector<8x128xf32>
    %14 = arith.select %12, %7, %13 : vector<8x128xi1>, vector<8x128xf32>
    %cst_10 = arith.constant dense<0xFF800000> : vector<8xf32>
    %15 = vector.multi_reduction <maximumf>, %14, %cst_10 [1] : vector<8x128xf32> to vector<8xf32>
    %16 = vector.shape_cast %15 : vector<8xf32> to vector<8x1xf32>
    %c0_11 = arith.constant 0 : index
    %c0_12 = arith.constant 0 : index
    %17 = vector.load %arg4[%c0_11, %c0_12] : memref<8x3xf32, #tpu.memory_space<vmem>>, vector<8x3xf32>
    %c0_13 = arith.constant 0 : index
    %c0_14 = arith.constant 0 : index
    %18 = vector.load %arg5[%c0_13, %c0_14] : memref<8x3xf32, #tpu.memory_space<vmem>>, vector<8x3xf32>
    %c0_15 = arith.constant 0 : index
    %c0_16 = arith.constant 0 : index
    %19 = vector.load %arg6[%c0_15, %c0_16] : memref<8x1xf32, #tpu.memory_space<vmem>>, vector<8x1xf32>
    %cst_17 = arith.constant 5.000000e-01 : f32
    %20 = vector.broadcast %cst_17 : f32 to vector<8x1xf32>
    %21 = arith.cmpf ogt, %19, %20 : vector<8x1xf32>
    %false = arith.constant false
    %22 = vector.broadcast %false : i1 to vector<8x1xi1>
    %23 = vector.extract_strided_slice %17 {offsets = [0, 0], sizes = [8, 1], strides = [1, 1]} : vector<8x3xf32> to vector<8x1xf32>
    %cst_18 = arith.constant 5.000000e-01 : f32
    %24 = vector.broadcast %cst_18 : f32 to vector<8x1xf32>
    %25 = arith.cmpf ogt, %23, %24 : vector<8x1xf32>
    %26 = vector.extract_strided_slice %18 {offsets = [0, 0], sizes = [8, 1], strides = [1, 1]} : vector<8x3xf32> to vector<8x1xf32>
    %cst_19 = arith.constant 1.000000e+00 : f32
    %27 = vector.broadcast %cst_19 : f32 to vector<8x1xf32>
    %28 = arith.divf %27, %26 : vector<8x1xf32>
    %29 = arith.mulf %16, %28 : vector<8x1xf32>
    %30 = arith.mulf %4, %28 : vector<8x1xf32>
    %31 = arith.maximumf %29, %30 : vector<8x1xf32>
    %32 = vector.broadcast %28 : vector<8x1xf32> to vector<8x128xf32>
    %33 = arith.mulf %14, %32 : vector<8x128xf32>
    %34 = vector.broadcast %31 : vector<8x1xf32> to vector<8x128xf32>
    %35 = arith.subf %33, %34 : vector<8x128xf32>
    %36 = math.exp %35 : vector<8x128xf32>
    %cst_20 = arith.constant dense<0.000000e+00> : vector<8xf32>
    %37 = vector.multi_reduction <add>, %36, %cst_20 [1] : vector<8x128xf32> to vector<8xf32>
    %38 = vector.shape_cast %37 : vector<8xf32> to vector<8x1xf32>
    %39 = arith.subf %30, %31 : vector<8x1xf32>
    %40 = math.exp %39 : vector<8x1xf32>
    %cst_21 = arith.constant 0.000000e+00 : f32
    %41 = vector.broadcast %cst_21 : f32 to vector<8x1xf32>
    %42 = arith.select %25, %38, %41 : vector<8x1xi1>, vector<8x1xf32>
    %43 = arith.addf %42, %40 : vector<8x1xf32>
    %44 = arith.addf %38, %40 : vector<8x1xf32>
    %45 = arith.divf %43, %44 : vector<8x1xf32>
    %cst_22 = arith.constant dense<true> : vector<8x1xi1>
    %46 = arith.xori %22, %cst_22 : vector<8x1xi1>
    %47 = arith.ori %25, %46 : vector<8x1xi1>
    %cst_23 = arith.constant 1.000000e-07 : f32
    %48 = vector.broadcast %cst_23 : f32 to vector<8x1xf32>
    %49 = arith.cmpf ogt, %45, %48 : vector<8x1xf32>
    %50 = arith.andi %47, %49 : vector<8x1xi1>
    %51 = arith.andi %50, %21 : vector<8x1xi1>
    %cst_24 = arith.constant 1.000000e+00 : f32
    %52 = vector.broadcast %cst_24 : f32 to vector<8x1xf32>
    %53 = arith.select %51, %45, %52 : vector<8x1xi1>, vector<8x1xf32>
    %54 = math.log %53 : vector<8x1xf32>
    %cst_25 = arith.constant 0.000000e+00 : f32
    %55 = vector.broadcast %cst_25 : f32 to vector<8x1xf32>
    %56 = arith.subf %55, %54 : vector<8x1xf32>
    %cst_26 = arith.constant 0.000000e+00 : f32
    %57 = vector.broadcast %cst_26 : f32 to vector<8x1xf32>
    %58 = arith.select %51, %56, %57 : vector<8x1xi1>, vector<8x1xf32>
    %59 = vector.shape_cast %58 : vector<8x1xf32> to vector<1x8x1xf32>
    %cst_27 = arith.constant dense<0.000000e+00> : vector<1xf32>
    %60 = vector.multi_reduction <add>, %59, %cst_27 [1, 2] : vector<1x8x1xf32> to vector<1xf32>
    %61 = vector.shape_cast %60 : vector<1xf32> to vector<1x1x1xf32>
    %62 = vector.extract %61[0, 0, 0] : f32 from vector<1x1x1xf32>
    %63 = vector.broadcast %62 : f32 to vector<1x1xf32>
    %64 = arith.extui %51 : vector<8x1xi1> to vector<8x1xi32>
    %65 = arith.sitofp %64 : vector<8x1xi32> to vector<8x1xf32>
    %66 = vector.shape_cast %65 : vector<8x1xf32> to vector<1x8x1xf32>
    %cst_28 = arith.constant dense<0.000000e+00> : vector<1xf32>
    %67 = vector.multi_reduction <add>, %66, %cst_28 [1, 2] : vector<1x8x1xf32> to vector<1xf32>
    %68 = vector.shape_cast %67 : vector<1xf32> to vector<1x1x1xf32>
    %69 = vector.extract %68[0, 0, 0] : f32 from vector<1x1x1xf32>
    %70 = vector.broadcast %69 : f32 to vector<1x1xf32>
    %71 = arith.ori %22, %25 : vector<8x1xi1>
    %72 = vector.extract_strided_slice %17 {offsets = [0, 1], sizes = [8, 1], strides = [1, 1]} : vector<8x3xf32> to vector<8x1xf32>
    %cst_29 = arith.constant 5.000000e-01 : f32
    %73 = vector.broadcast %cst_29 : f32 to vector<8x1xf32>
    %74 = arith.cmpf ogt, %72, %73 : vector<8x1xf32>
    %75 = vector.extract_strided_slice %18 {offsets = [0, 1], sizes = [8, 1], strides = [1, 1]} : vector<8x3xf32> to vector<8x1xf32>
    %cst_30 = arith.constant 1.000000e+00 : f32
    %76 = vector.broadcast %cst_30 : f32 to vector<8x1xf32>
    %77 = arith.divf %76, %75 : vector<8x1xf32>
    %78 = arith.mulf %16, %77 : vector<8x1xf32>
    %79 = vector.broadcast %77 : vector<8x1xf32> to vector<8x128xf32>
    %80 = arith.mulf %14, %79 : vector<8x128xf32>
    %81 = vector.broadcast %78 : vector<8x1xf32> to vector<8x128xf32>
    %82 = arith.subf %80, %81 : vector<8x128xf32>
    %83 = math.exp %82 : vector<8x128xf32>
    %cst_31 = arith.constant dense<0.000000e+00> : vector<8xf32>
    %84 = vector.multi_reduction <add>, %83, %cst_31 [1] : vector<8x128xf32> to vector<8xf32>
    %85 = vector.shape_cast %84 : vector<8xf32> to vector<8x1xf32>
    %cst_32 = arith.constant 0.000000e+00 : f32
    %86 = vector.broadcast %cst_32 : f32 to vector<8x1xf32>
    %87 = arith.select %74, %85, %86 : vector<8x1xi1>, vector<8x1xf32>
    %88 = arith.divf %87, %85 : vector<8x1xf32>
    %cst_33 = arith.constant dense<true> : vector<8x1xi1>
    %89 = arith.xori %71, %cst_33 : vector<8x1xi1>
    %90 = arith.ori %74, %89 : vector<8x1xi1>
    %cst_34 = arith.constant 1.000000e-07 : f32
    %91 = vector.broadcast %cst_34 : f32 to vector<8x1xf32>
    %92 = arith.cmpf ogt, %88, %91 : vector<8x1xf32>
    %93 = arith.andi %90, %92 : vector<8x1xi1>
    %94 = arith.andi %93, %21 : vector<8x1xi1>
    %cst_35 = arith.constant 1.000000e+00 : f32
    %95 = vector.broadcast %cst_35 : f32 to vector<8x1xf32>
    %96 = arith.select %94, %88, %95 : vector<8x1xi1>, vector<8x1xf32>
    %97 = math.log %96 : vector<8x1xf32>
    %cst_36 = arith.constant 0.000000e+00 : f32
    %98 = vector.broadcast %cst_36 : f32 to vector<8x1xf32>
    %99 = arith.subf %98, %97 : vector<8x1xf32>
    %cst_37 = arith.constant 0.000000e+00 : f32
    %100 = vector.broadcast %cst_37 : f32 to vector<8x1xf32>
    %101 = arith.select %94, %99, %100 : vector<8x1xi1>, vector<8x1xf32>
    %102 = vector.shape_cast %101 : vector<8x1xf32> to vector<1x8x1xf32>
    %cst_38 = arith.constant dense<0.000000e+00> : vector<1xf32>
    %103 = vector.multi_reduction <add>, %102, %cst_38 [1, 2] : vector<1x8x1xf32> to vector<1xf32>
    %104 = vector.shape_cast %103 : vector<1xf32> to vector<1x1x1xf32>
    %105 = vector.extract %104[0, 0, 0] : f32 from vector<1x1x1xf32>
    %106 = vector.broadcast %105 : f32 to vector<1x1xf32>
    %107 = arith.extui %94 : vector<8x1xi1> to vector<8x1xi32>
    %108 = arith.sitofp %107 : vector<8x1xi32> to vector<8x1xf32>
    %109 = vector.shape_cast %108 : vector<8x1xf32> to vector<1x8x1xf32>
    %cst_39 = arith.constant dense<0.000000e+00> : vector<1xf32>
    %110 = vector.multi_reduction <add>, %109, %cst_39 [1, 2] : vector<1x8x1xf32> to vector<1xf32>
    %111 = vector.shape_cast %110 : vector<1xf32> to vector<1x1x1xf32>
    %112 = vector.extract %111[0, 0, 0] : f32 from vector<1x1x1xf32>
    %113 = vector.broadcast %112 : f32 to vector<1x1xf32>
    %114 = arith.ori %71, %74 : vector<8x1xi1>
    %115 = vector.extract_strided_slice %17 {offsets = [0, 2], sizes = [8, 1], strides = [1, 1]} : vector<8x3xf32> to vector<8x1xf32>
    %cst_40 = arith.constant 5.000000e-01 : f32
    %116 = vector.broadcast %cst_40 : f32 to vector<8x1xf32>
    %117 = arith.cmpf ogt, %115, %116 : vector<8x1xf32>
    %118 = vector.extract_strided_slice %18 {offsets = [0, 2], sizes = [8, 1], strides = [1, 1]} : vector<8x3xf32> to vector<8x1xf32>
    %cst_41 = arith.constant 1.000000e+00 : f32
    %119 = vector.broadcast %cst_41 : f32 to vector<8x1xf32>
    %120 = arith.divf %119, %118 : vector<8x1xf32>
    %121 = arith.mulf %16, %120 : vector<8x1xf32>
    %122 = vector.broadcast %120 : vector<8x1xf32> to vector<8x128xf32>
    %123 = arith.mulf %14, %122 : vector<8x128xf32>
    %124 = vector.broadcast %121 : vector<8x1xf32> to vector<8x128xf32>
    %125 = arith.subf %123, %124 : vector<8x128xf32>
    %126 = math.exp %125 : vector<8x128xf32>
    %cst_42 = arith.constant dense<0.000000e+00> : vector<8xf32>
    %127 = vector.multi_reduction <add>, %126, %cst_42 [1] : vector<8x128xf32> to vector<8xf32>
    %128 = vector.shape_cast %127 : vector<8xf32> to vector<8x1xf32>
    %cst_43 = arith.constant 0.000000e+00 : f32
    %129 = vector.broadcast %cst_43 : f32 to vector<8x1xf32>
    %130 = arith.select %117, %128, %129 : vector<8x1xi1>, vector<8x1xf32>
    %131 = arith.divf %130, %128 : vector<8x1xf32>
    %cst_44 = arith.constant dense<true> : vector<8x1xi1>
    %132 = arith.xori %114, %cst_44 : vector<8x1xi1>
    %133 = arith.ori %117, %132 : vector<8x1xi1>
    %cst_45 = arith.constant 1.000000e-07 : f32
    %134 = vector.broadcast %cst_45 : f32 to vector<8x1xf32>
    %135 = arith.cmpf ogt, %131, %134 : vector<8x1xf32>
    %136 = arith.andi %133, %135 : vector<8x1xi1>
    %137 = arith.andi %136, %21 : vector<8x1xi1>
    %cst_46 = arith.constant 1.000000e+00 : f32
    %138 = vector.broadcast %cst_46 : f32 to vector<8x1xf32>
    %139 = arith.select %137, %131, %138 : vector<8x1xi1>, vector<8x1xf32>
    %140 = math.log %139 : vector<8x1xf32>
    %cst_47 = arith.constant 0.000000e+00 : f32
    %141 = vector.broadcast %cst_47 : f32 to vector<8x1xf32>
    %142 = arith.subf %141, %140 : vector<8x1xf32>
    %cst_48 = arith.constant 0.000000e+00 : f32
    %143 = vector.broadcast %cst_48 : f32 to vector<8x1xf32>
    %144 = arith.select %137, %142, %143 : vector<8x1xi1>, vector<8x1xf32>
    %145 = vector.shape_cast %144 : vector<8x1xf32> to vector<1x8x1xf32>
    %cst_49 = arith.constant dense<0.000000e+00> : vector<1xf32>
    %146 = vector.multi_reduction <add>, %145, %cst_49 [1, 2] : vector<1x8x1xf32> to vector<1xf32>
    %147 = vector.shape_cast %146 : vector<1xf32> to vector<1x1x1xf32>
    %148 = vector.extract %147[0, 0, 0] : f32 from vector<1x1x1xf32>
    %149 = vector.broadcast %148 : f32 to vector<1x1xf32>
    %150 = arith.extui %137 : vector<8x1xi1> to vector<8x1xi32>
    %151 = arith.sitofp %150 : vector<8x1xi32> to vector<8x1xf32>
    %152 = vector.shape_cast %151 : vector<8x1xf32> to vector<1x8x1xf32>
    %cst_50 = arith.constant dense<0.000000e+00> : vector<1xf32>
    %153 = vector.multi_reduction <add>, %152, %cst_50 [1, 2] : vector<1x8x1xf32> to vector<1xf32>
    %154 = vector.shape_cast %153 : vector<1xf32> to vector<1x1x1xf32>
    %155 = vector.extract %154[0, 0, 0] : f32 from vector<1x1x1xf32>
    %156 = vector.broadcast %155 : f32 to vector<1x1xf32>
    %157 = tpu.iota {dimensions = array<i32: 0>} : vector<8x128xi32>
    %158 = tpu.iota {dimensions = array<i32: 1>} : vector<8x128xi32>
    %cst_51 = arith.constant 0.000000e+00 : f32
    %159 = vector.broadcast %cst_51 : f32 to vector<8x128xf32>
    %c0_i32 = arith.constant 0 : i32
    %160 = vector.broadcast %c0_i32 : i32 to vector<8x128xi32>
    %161 = arith.cmpi eq, %157, %160 : vector<8x128xi32>
    %c0_i32_52 = arith.constant 0 : i32
    %162 = vector.broadcast %c0_i32_52 : i32 to vector<8x128xi32>
    %163 = arith.cmpi eq, %158, %162 : vector<8x128xi32>
    %164 = arith.andi %161, %163 : vector<8x128xi1>
    %cst_53 = arith.constant 0.000000e+00 : f32
    %165 = vector.shape_cast %63 : vector<1x1xf32> to vector<1x1xf32>
    %166 = vector.broadcast %165 : vector<1x1xf32> to vector<8x128xf32>
    %167 = vector.broadcast %cst_53 : f32 to vector<8x128xf32>
    %168 = arith.select %164, %166, %167 : vector<8x128xi1>, vector<8x128xf32>
    %169 = arith.addf %159, %168 : vector<8x128xf32>
    %c1_i32 = arith.constant 1 : i32
    %170 = vector.broadcast %c1_i32 : i32 to vector<8x128xi32>
    %171 = arith.cmpi eq, %157, %170 : vector<8x128xi32>
    %c0_i32_54 = arith.constant 0 : i32
    %172 = vector.broadcast %c0_i32_54 : i32 to vector<8x128xi32>
    %173 = arith.cmpi eq, %158, %172 : vector<8x128xi32>
    %174 = arith.andi %171, %173 : vector<8x128xi1>
    %cst_55 = arith.constant 0.000000e+00 : f32
    %175 = vector.shape_cast %70 : vector<1x1xf32> to vector<1x1xf32>
    %176 = vector.broadcast %175 : vector<1x1xf32> to vector<8x128xf32>
    %177 = vector.broadcast %cst_55 : f32 to vector<8x128xf32>
    %178 = arith.select %174, %176, %177 : vector<8x128xi1>, vector<8x128xf32>
    %179 = arith.addf %169, %178 : vector<8x128xf32>
    %c0_i32_56 = arith.constant 0 : i32
    %180 = vector.broadcast %c0_i32_56 : i32 to vector<8x128xi32>
    %181 = arith.cmpi eq, %157, %180 : vector<8x128xi32>
    %c1_i32_57 = arith.constant 1 : i32
    %182 = vector.broadcast %c1_i32_57 : i32 to vector<8x128xi32>
    %183 = arith.cmpi eq, %158, %182 : vector<8x128xi32>
    %184 = arith.andi %181, %183 : vector<8x128xi1>
    %cst_58 = arith.constant 0.000000e+00 : f32
    %185 = vector.shape_cast %106 : vector<1x1xf32> to vector<1x1xf32>
    %186 = vector.broadcast %185 : vector<1x1xf32> to vector<8x128xf32>
    %187 = vector.broadcast %cst_58 : f32 to vector<8x128xf32>
    %188 = arith.select %184, %186, %187 : vector<8x128xi1>, vector<8x128xf32>
    %189 = arith.addf %179, %188 : vector<8x128xf32>
    %c1_i32_59 = arith.constant 1 : i32
    %190 = vector.broadcast %c1_i32_59 : i32 to vector<8x128xi32>
    %191 = arith.cmpi eq, %157, %190 : vector<8x128xi32>
    %c1_i32_60 = arith.constant 1 : i32
    %192 = vector.broadcast %c1_i32_60 : i32 to vector<8x128xi32>
    %193 = arith.cmpi eq, %158, %192 : vector<8x128xi32>
    %194 = arith.andi %191, %193 : vector<8x128xi1>
    %cst_61 = arith.constant 0.000000e+00 : f32
    %195 = vector.shape_cast %113 : vector<1x1xf32> to vector<1x1xf32>
    %196 = vector.broadcast %195 : vector<1x1xf32> to vector<8x128xf32>
    %197 = vector.broadcast %cst_61 : f32 to vector<8x128xf32>
    %198 = arith.select %194, %196, %197 : vector<8x128xi1>, vector<8x128xf32>
    %199 = arith.addf %189, %198 : vector<8x128xf32>
    %c0_i32_62 = arith.constant 0 : i32
    %200 = vector.broadcast %c0_i32_62 : i32 to vector<8x128xi32>
    %201 = arith.cmpi eq, %157, %200 : vector<8x128xi32>
    %c2_i32 = arith.constant 2 : i32
    %202 = vector.broadcast %c2_i32 : i32 to vector<8x128xi32>
    %203 = arith.cmpi eq, %158, %202 : vector<8x128xi32>
    %204 = arith.andi %201, %203 : vector<8x128xi1>
    %cst_63 = arith.constant 0.000000e+00 : f32
    %205 = vector.shape_cast %149 : vector<1x1xf32> to vector<1x1xf32>
    %206 = vector.broadcast %205 : vector<1x1xf32> to vector<8x128xf32>
    %207 = vector.broadcast %cst_63 : f32 to vector<8x128xf32>
    %208 = arith.select %204, %206, %207 : vector<8x128xi1>, vector<8x128xf32>
    %209 = arith.addf %199, %208 : vector<8x128xf32>
    %c1_i32_64 = arith.constant 1 : i32
    %210 = vector.broadcast %c1_i32_64 : i32 to vector<8x128xi32>
    %211 = arith.cmpi eq, %157, %210 : vector<8x128xi32>
    %c2_i32_65 = arith.constant 2 : i32
    %212 = vector.broadcast %c2_i32_65 : i32 to vector<8x128xi32>
    %213 = arith.cmpi eq, %158, %212 : vector<8x128xi32>
    %214 = arith.andi %211, %213 : vector<8x128xi1>
    %cst_66 = arith.constant 0.000000e+00 : f32
    %215 = vector.shape_cast %156 : vector<1x1xf32> to vector<1x1xf32>
    %216 = vector.broadcast %215 : vector<1x1xf32> to vector<8x128xf32>
    %217 = vector.broadcast %cst_66 : f32 to vector<8x128xf32>
    %218 = arith.select %214, %216, %217 : vector<8x128xi1>, vector<8x128xf32>
    %219 = arith.addf %209, %218 : vector<8x128xf32>
    %220 = vector.shape_cast %219 : vector<8x128xf32> to vector<1x8x128xf32>
    %c0_67 = arith.constant 0 : index
    %c0_68 = arith.constant 0 : index
    %c0_69 = arith.constant 0 : index
    %221 = vector.load %arg8[%c0_67, %c0_68, %c0_69] : memref<1x8x128xf32, #tpu.memory_space<vmem>>, vector<1x8x128xf32>
    tpu.vector_store %arg8[%c0_67, %c0_68, %c0_69], %220 {strides = array<i32>} : memref<1x8x128xf32, #tpu.memory_space<vmem>>, vector<1x8x128xf32>,
    return
  }
  func.func @transform_0(%arg0: i32) -> (i32, i32) {
    %c0_i32 = arith.constant 0 : i32
    %c0_i32_0 = arith.constant 0 : i32
    return %arg0, %c0_i32 : i32, i32
  }
  func.func @transform_1(%arg0: i32) -> (i32, i32) {
    %c0_i32 = arith.constant 0 : i32
    %c0_i32_0 = arith.constant 0 : i32
    return %arg0, %c0_i32 : i32, i32
  }
  func.func @transform_2(%arg0: i32) -> (i32, i32) {
    %c0_i32 = arith.constant 0 : i32
    %c0_i32_0 = arith.constant 0 : i32
    %c0_i32_1 = arith.constant 0 : i32
    return %c0_i32, %c0_i32_0 : i32, i32
  }
  func.func @transform_3(%arg0: i32) -> (i32, i32) {
    %c0_i32 = arith.constant 0 : i32
    %c0_i32_0 = arith.constant 0 : i32
    return %arg0, %c0_i32 : i32, i32
  }
  func.func @transform_4(%arg0: i32) -> (i32, i32) {
    %c0_i32 = arith.constant 0 : i32
    %c0_i32_0 = arith.constant 0 : i32
    return %arg0, %c0_i32 : i32, i32
  }
  func.func @transform_5(%arg0: i32) -> (i32, i32) {
    %c0_i32 = arith.constant 0 : i32
    %c0_i32_0 = arith.constant 0 : i32
    return %arg0, %c0_i32 : i32, i32
  }
  func.func @transform_6(%arg0: i32) -> (i32, i32) {
    %c0_i32 = arith.constant 0 : i32
    %c0_i32_0 = arith.constant 0 : i32
    %c0_i32_1 = arith.constant 0 : i32
    return %c0_i32, %c0_i32_0 : i32, i32
  }
  func.func @transform_7(%arg0: i32) -> (i32, i32, i32) {
    %c0_i32 = arith.constant 0 : i32
    %c0_i32_0 = arith.constant 0 : i32
    %c0_i32_1 = arith.constant 0 : i32
    return %arg0, %c0_i32, %c0_i32_0 : i32, i32, i32
  }
}

module attributes {stable_mosaic.version = 11 : i64} {
  func.func @_cr_rank_kernel(%arg0: i32, %arg1: memref<8x128xf32, #tpu.memory_space<vmem>>, %arg2: memref<8x128xf32, #tpu.memory_space<vmem>>, %arg3: memref<128x128xbf16, #tpu.memory_space<vmem>>, %arg4: memref<8x3xf32, #tpu.memory_space<vmem>>, %arg5: memref<8x3xf32, #tpu.memory_space<vmem>>, %arg6: memref<8x1xf32, #tpu.memory_space<vmem>>, %arg7: memref<1x128xf32, #tpu.memory_space<vmem>>, %arg8: memref<1x8x128xf32, #tpu.memory_space<vmem>>) attributes {dimension_semantics = [#tpu.dimension_semantics<parallel>], iteration_bounds = array<i64: 1>, scalar_prefetch = 0 : i64, scratch_operands = 0 : i64, tpu.core_type = #tpu.core_type<tc>, window_params = [{transform_indices = @transform_0, window_bounds = array<i64: 8, 128>}, {transform_indices = @transform_1, window_bounds = array<i64: 8, 128>}, {pipeline_mode = #tpu.pipeline_mode<synchronous>, transform_indices = @transform_2, window_bounds = array<i64: 128, 128>}, {transform_indices = @transform_3, window_bounds = array<i64: 8, 3>}, {transform_indices = @transform_4, window_bounds = array<i64: 8, 3>}, {transform_indices = @transform_5, window_bounds = array<i64: 8, 1>}, {pipeline_mode = #tpu.pipeline_mode<synchronous>, transform_indices = @transform_6, window_bounds = array<i64: 1, 128>}, {transform_indices = @transform_7, window_bounds = array<i64: 1, 8, 128>}]} {
    %c0 = arith.constant 0 : index
    %c0_0 = arith.constant 0 : index
    %0 = vector.load %arg1[%c0, %c0_0] : memref<8x128xf32, #tpu.memory_space<vmem>>, vector<8x128xf32>
    %c0_1 = arith.constant 0 : index
    %c0_2 = arith.constant 0 : index
    %1 = vector.load %arg2[%c0_1, %c0_2] : memref<8x128xf32, #tpu.memory_space<vmem>>, vector<8x128xf32>
    %2 = arith.mulf %0, %1 : vector<8x128xf32>
    %cst = arith.constant dense<0.000000e+00> : vector<8xf32>
    %3 = vector.multi_reduction <add>, %2, %cst [1] : vector<8x128xf32> to vector<8xf32>
    %4 = vector.shape_cast %3 : vector<8xf32> to vector<8x1xf32>
    %5 = arith.truncf %0 : vector<8x128xf32> to vector<8x128xbf16>
    %c0_3 = arith.constant 0 : index
    %c0_4 = arith.constant 0 : index
    %6 = vector.load %arg3[%c0_3, %c0_4] : memref<128x128xbf16, #tpu.memory_space<vmem>>, vector<128x128xbf16>
    %cst_5 = arith.constant dense<0.000000e+00> : vector<8x128xf32>
    %7 = tpu.matmul %5, %6, %cst_5 {dimension_numbers = #tpu.dot_dimension_numbers<[1], [0], [0], [1], [0, 0, 1, 1], [], []>} : vector<8x128xbf16>, vector<128x128xbf16>, vector<8x128xf32> -> vector<8x128xf32>
    %c0_6 = arith.constant 0 : index
    %c0_7 = arith.constant 0 : index
    %8 = vector.load %arg7[%c0_6, %c0_7] : memref<1x128xf32, #tpu.memory_space<vmem>>, vector<1x128xf32>
    %cst_8 = arith.constant 5.000000e-01 : f32
    %9 = vector.broadcast %cst_8 : f32 to vector<1x128xf32>
    %10 = arith.cmpf ogt, %8, %9 : vector<1x128xf32>
    %cst_9 = arith.constant -1.000000e+30 : f32
    %11 = vector.shape_cast %10 : vector<1x128xi1> to vector<1x128xi1>
    %12 = vector.broadcast %11 : vector<1x128xi1> to vector<8x128xi1>
    %13 = vector.broadcast %cst_9 : f32 to vector<8x128xf32>
    %14 = arith.select %12, %7, %13 : vector<8x128xi1>, vector<8x128xf32>
    %cst_10 = arith.constant dense<0xFF800000> : vector<8xf32>
    %15 = vector.multi_reduction <maximumf>, %14, %cst_10 [1] : vector<8x128xf32> to vector<8xf32>
    %16 = vector.shape_cast %15 : vector<8xf32> to vector<8x1xf32>
    %c0_11 = arith.constant 0 : index
    %c0_12 = arith.constant 0 : index
    %17 = vector.load %arg4[%c0_11, %c0_12] : memref<8x3xf32, #tpu.memory_space<vmem>>, vector<8x3xf32>
    %c0_13 = arith.constant 0 : index
    %c0_14 = arith.constant 0 : index
    %18 = vector.load %arg5[%c0_13, %c0_14] : memref<8x3xf32, #tpu.memory_space<vmem>>, vector<8x3xf32>
    %c0_15 = arith.constant 0 : index
    %c0_16 = arith.constant 0 : index
    %19 = vector.load %arg6[%c0_15, %c0_16] : memref<8x1xf32, #tpu.memory_space<vmem>>, vector<8x1xf32>
    %cst_17 = arith.constant 5.000000e-01 : f32
    %20 = vector.broadcast %cst_17 : f32 to vector<8x1xf32>
    %21 = arith.cmpf ogt, %19, %20 : vector<8x1xf32>
    %false = arith.constant false
    %22 = vector.broadcast %false : i1 to vector<8x1xi1>
    %23 = vector.extract_strided_slice %17 {offsets = [0, 0], sizes = [8, 1], strides = [1, 1]} : vector<8x3xf32> to vector<8x1xf32>
    %cst_18 = arith.constant 5.000000e-01 : f32
    %24 = vector.broadcast %cst_18 : f32 to vector<8x1xf32>
    %25 = arith.cmpf ogt, %23, %24 : vector<8x1xf32>
    %26 = vector.extract_strided_slice %18 {offsets = [0, 0], sizes = [8, 1], strides = [1, 1]} : vector<8x3xf32> to vector<8x1xf32>
    %cst_19 = arith.constant 1.000000e+00 : f32
    %27 = vector.broadcast %cst_19 : f32 to vector<8x1xf32>
    %28 = arith.divf %27, %26 : vector<8x1xf32>
    %29 = arith.mulf %16, %28 : vector<8x1xf32>
    %30 = arith.mulf %4, %28 : vector<8x1xf32>
    %31 = arith.maximumf %29, %30 : vector<8x1xf32>
    %32 = vector.broadcast %28 : vector<8x1xf32> to vector<8x128xf32>
    %33 = arith.mulf %14, %32 : vector<8x128xf32>
    %34 = vector.broadcast %31 : vector<8x1xf32> to vector<8x128xf32>
    %35 = arith.subf %33, %34 : vector<8x128xf32>
    %36 = math.exp %35 : vector<8x128xf32>
    %cst_20 = arith.constant dense<0.000000e+00> : vector<8xf32>
    %37 = vector.multi_reduction <add>, %36, %cst_20 [1] : vector<8x128xf32> to vector<8xf32>
    %38 = vector.shape_cast %37 : vector<8xf32> to vector<8x1xf32>
    %39 = arith.subf %30, %31 : vector<8x1xf32>
    %40 = math.exp %39 : vector<8x1xf32>
    %cst_21 = arith.constant 0.000000e+00 : f32
    %41 = vector.broadcast %cst_21 : f32 to vector<8x1xf32>
    %42 = arith.select %25, %38, %41 : vector<8x1xi1>, vector<8x1xf32>
    %43 = arith.addf %42, %40 : vector<8x1xf32>
    %44 = arith.addf %38, %40 : vector<8x1xf32>
    %45 = arith.divf %43, %44 : vector<8x1xf32>
    %cst_22 = arith.constant dense<true> : vector<8x1xi1>
    %46 = arith.xori %22, %cst_22 : vector<8x1xi1>
    %47 = arith.ori %25, %46 : vector<8x1xi1>
    %cst_23 = arith.constant 1.000000e-07 : f32
    %48 = vector.broadcast %cst_23 : f32 to vector<8x1xf32>
    %49 = arith.cmpf ogt, %45, %48 : vector<8x1xf32>
    %50 = arith.andi %47, %49 : vector<8x1xi1>
    %51 = arith.andi %50, %21 : vector<8x1xi1>
    %cst_24 = arith.constant 1.000000e+00 : f32
    %52 = vector.broadcast %cst_24 : f32 to vector<8x1xf32>
    %53 = arith.select %51, %45, %52 : vector<8x1xi1>, vector<8x1xf32>
    %54 = math.log %53 : vector<8x1xf32>
    %cst_25 = arith.constant 0.000000e+00 : f32
    %55 = vector.broadcast %cst_25 : f32 to vector<8x1xf32>
    %56 = arith.subf %55, %54 : vector<8x1xf32>
    %cst_26 = arith.constant 0.000000e+00 : f32
    %57 = vector.broadcast %cst_26 : f32 to vector<8x1xf32>
    %58 = arith.select %51, %56, %57 : vector<8x1xi1>, vector<8x1xf32>
    %59 = vector.shape_cast %58 : vector<8x1xf32> to vector<1x8x1xf32>
    %cst_27 = arith.constant dense<0.000000e+00> : vector<1xf32>
    %60 = vector.multi_reduction <add>, %59, %cst_27 [1, 2] : vector<1x8x1xf32> to vector<1xf32>
    %61 = vector.shape_cast %60 : vector<1xf32> to vector<1x1x1xf32>
    %62 = vector.extract %61[0, 0, 0] : f32 from vector<1x1x1xf32>
    %63 = vector.broadcast %62 : f32 to vector<1x1xf32>
    %64 = arith.extui %51 : vector<8x1xi1> to vector<8x1xi32>
    %65 = arith.sitofp %64 : vector<8x1xi32> to vector<8x1xf32>
    %66 = vector.shape_cast %65 : vector<8x1xf32> to vector<1x8x1xf32>
    %cst_28 = arith.constant dense<0.000000e+00> : vector<1xf32>
    %67 = vector.multi_reduction <add>, %66, %cst_28 [1, 2] : vector<1x8x1xf32> to vector<1xf32>
    %68 = vector.shape_cast %67 : vector<1xf32> to vector<1x1x1xf32>
    %69 = vector.extract %68[0, 0, 0] : f32 from vector<1x1x1xf32>
    %70 = vector.broadcast %69 : f32 to vector<1x1xf32>
    %71 = arith.ori %22, %25 : vector<8x1xi1>
    %72 = vector.extract_strided_slice %17 {offsets = [0, 1], sizes = [8, 1], strides = [1, 1]} : vector<8x3xf32> to vector<8x1xf32>
    %cst_29 = arith.constant 5.000000e-01 : f32
    %73 = vector.broadcast %cst_29 : f32 to vector<8x1xf32>
    %74 = arith.cmpf ogt, %72, %73 : vector<8x1xf32>
    %75 = vector.extract_strided_slice %18 {offsets = [0, 1], sizes = [8, 1], strides = [1, 1]} : vector<8x3xf32> to vector<8x1xf32>
    %cst_30 = arith.constant 1.000000e+00 : f32
    %76 = vector.broadcast %cst_30 : f32 to vector<8x1xf32>
    %77 = arith.divf %76, %75 : vector<8x1xf32>
    %78 = arith.mulf %16, %77 : vector<8x1xf32>
    %79 = vector.broadcast %77 : vector<8x1xf32> to vector<8x128xf32>
    %80 = arith.mulf %14, %79 : vector<8x128xf32>
    %81 = vector.broadcast %78 : vector<8x1xf32> to vector<8x128xf32>
    %82 = arith.subf %80, %81 : vector<8x128xf32>
    %83 = math.exp %82 : vector<8x128xf32>
    %cst_31 = arith.constant dense<0.000000e+00> : vector<8xf32>
    %84 = vector.multi_reduction <add>, %83, %cst_31 [1] : vector<8x128xf32> to vector<8xf32>
    %85 = vector.shape_cast %84 : vector<8xf32> to vector<8x1xf32>
    %cst_32 = arith.constant 0.000000e+00 : f32
    %86 = vector.broadcast %cst_32 : f32 to vector<8x1xf32>
    %87 = arith.select %74, %85, %86 : vector<8x1xi1>, vector<8x1xf32>
    %88 = arith.divf %87, %85 : vector<8x1xf32>
    %cst_33 = arith.constant dense<true> : vector<8x1xi1>
    %89 = arith.xori %71, %cst_33 : vector<8x1xi1>
    %90 = arith.ori %74, %89 : vector<8x1xi1>
    %cst_34 = arith.constant 1.000000e-07 : f32
    %91 = vector.broadcast %cst_34 : f32 to vector<8x1xf32>
    %92 = arith.cmpf ogt, %88, %91 : vector<8x1xf32>
    %93 = arith.andi %90, %92 : vector<8x1xi1>
    %94 = arith.andi %93, %21 : vector<8x1xi1>
    %cst_35 = arith.constant 1.000000e+00 : f32
    %95 = vector.broadcast %cst_35 : f32 to vector<8x1xf32>
    %96 = arith.select %94, %88, %95 : vector<8x1xi1>, vector<8x1xf32>
    %97 = math.log %96 : vector<8x1xf32>
    %cst_36 = arith.constant 0.000000e+00 : f32
    %98 = vector.broadcast %cst_36 : f32 to vector<8x1xf32>
    %99 = arith.subf %98, %97 : vector<8x1xf32>
    %cst_37 = arith.constant 0.000000e+00 : f32
    %100 = vector.broadcast %cst_37 : f32 to vector<8x1xf32>
    %101 = arith.select %94, %99, %100 : vector<8x1xi1>, vector<8x1xf32>
    %102 = vector.shape_cast %101 : vector<8x1xf32> to vector<1x8x1xf32>
    %cst_38 = arith.constant dense<0.000000e+00> : vector<1xf32>
    %103 = vector.multi_reduction <add>, %102, %cst_38 [1, 2] : vector<1x8x1xf32> to vector<1xf32>
    %104 = vector.shape_cast %103 : vector<1xf32> to vector<1x1x1xf32>
    %105 = vector.extract %104[0, 0, 0] : f32 from vector<1x1x1xf32>
    %106 = vector.broadcast %105 : f32 to vector<1x1xf32>
    %107 = arith.extui %94 : vector<8x1xi1> to vector<8x1xi32>
    %108 = arith.sitofp %107 : vector<8x1xi32> to vector<8x1xf32>
    %109 = vector.shape_cast %108 : vector<8x1xf32> to vector<1x8x1xf32>
    %cst_39 = arith.constant dense<0.000000e+00> : vector<1xf32>
    %110 = vector.multi_reduction <add>, %109, %cst_39 [1, 2] : vector<1x8x1xf32> to vector<1xf32>
    %111 = vector.shape_cast %110 : vector<1xf32> to vector<1x1x1xf32>
    %112 = vector.extract %111[0, 0, 0] : f32 from vector<1x1x1xf32>
    %113 = vector.broadcast %112 : f32 to vector<1x1xf32>
    %114 = arith.ori %71, %74 : vector<8x1xi1>
    %115 = vector.extract_strided_slice %17 {offsets = [0, 2], sizes = [8, 1], strides = [1, 1]} : vector<8x3xf32> to vector<8x1xf32>
    %cst_40 = arith.constant 5.000000e-01 : f32
    %116 = vector.broadcast %cst_40 : f32 to vector<8x1xf32>
    %117 = arith.cmpf ogt, %115, %116 : vector<8x1xf32>
    %118 = vector.extract_strided_slice %18 {offsets = [0, 2], sizes = [8, 1], strides = [1, 1]} : vector<8x3xf32> to vector<8x1xf32>
    %cst_41 = arith.constant 1.000000e+00 : f32
    %119 = vector.broadcast %cst_41 : f32 to vector<8x1xf32>
    %120 = arith.divf %119, %118 : vector<8x1xf32>
    %121 = arith.mulf %16, %120 : vector<8x1xf32>
    %122 = vector.broadcast %120 : vector<8x1xf32> to vector<8x128xf32>
    %123 = arith.mulf %14, %122 : vector<8x128xf32>
    %124 = vector.broadcast %121 : vector<8x1xf32> to vector<8x128xf32>
    %125 = arith.subf %123, %124 : vector<8x128xf32>
    %126 = math.exp %125 : vector<8x128xf32>
    %cst_42 = arith.constant dense<0.000000e+00> : vector<8xf32>
    %127 = vector.multi_reduction <add>, %126, %cst_42 [1] : vector<8x128xf32> to vector<8xf32>
    %128 = vector.shape_cast %127 : vector<8xf32> to vector<8x1xf32>
    %cst_43 = arith.constant 0.000000e+00 : f32
    %129 = vector.broadcast %cst_43 : f32 to vector<8x1xf32>
    %130 = arith.select %117, %128, %129 : vector<8x1xi1>, vector<8x1xf32>
    %131 = arith.divf %130, %128 : vector<8x1xf32>
    %cst_44 = arith.constant dense<true> : vector<8x1xi1>
    %132 = arith.xori %114, %cst_44 : vector<8x1xi1>
    %133 = arith.ori %117, %132 : vector<8x1xi1>
    %cst_45 = arith.constant 1.000000e-07 : f32
    %134 = vector.broadcast %cst_45 : f32 to vector<8x1xf32>
    %135 = arith.cmpf ogt, %131, %134 : vector<8x1xf32>
    %136 = arith.andi %133, %135 : vector<8x1xi1>
    %137 = arith.andi %136, %21 : vector<8x1xi1>
    %cst_46 = arith.constant 1.000000e+00 : f32
    %138 = vector.broadcast %cst_46 : f32 to vector<8x1xf32>
    %139 = arith.select %137, %131, %138 : vector<8x1xi1>, vector<8x1xf32>
    %140 = math.log %139 : vector<8x1xf32>
    %cst_47 = arith.constant 0.000000e+00 : f32
    %141 = vector.broadcast %cst_47 : f32 to vector<8x1xf32>
    %142 = arith.subf %141, %140 : vector<8x1xf32>
    %cst_48 = arith.constant 0.000000e+00 : f32
    %143 = vector.broadcast %cst_48 : f32 to vector<8x1xf32>
    %144 = arith.select %137, %142, %143 : vector<8x1xi1>, vector<8x1xf32>
    %145 = vector.shape_cast %144 : vector<8x1xf32> to vector<1x8x1xf32>
    %cst_49 = arith.constant dense<0.000000e+00> : vector<1xf32>
    %146 = vector.multi_reduction <add>, %145, %cst_49 [1, 2] : vector<1x8x1xf32> to vector<1xf32>
    %147 = vector.shape_cast %146 : vector<1xf32> to vector<1x1x1xf32>
    %148 = vector.extract %147[0, 0, 0] : f32 from vector<1x1x1xf32>
    %149 = vector.broadcast %148 : f32 to vector<1x1xf32>
    %150 = arith.extui %137 : vector<8x1xi1> to vector<8x1xi32>
    %151 = arith.sitofp %150 : vector<8x1xi32> to vector<8x1xf32>
    %152 = vector.shape_cast %151 : vector<8x1xf32> to vector<1x8x1xf32>
    %cst_50 = arith.constant dense<0.000000e+00> : vector<1xf32>
    %153 = vector.multi_reduction <add>, %152, %cst_50 [1, 2] : vector<1x8x1xf32> to vector<1xf32>
    %154 = vector.shape_cast %153 : vector<1xf32> to vector<1x1x1xf32>
    %155 = vector.extract %154[0, 0, 0] : f32 from vector<1x1x1xf32>
    %156 = vector.broadcast %155 : f32 to vector<1x1xf32>
    %157 = tpu.iota {dimensions = array<i32: 0>} : vector<8x128xi32>
    %158 = tpu.iota {dimensions = array<i32: 1>} : vector<8x128xi32>
    %cst_51 = arith.constant 0.000000e+00 : f32
    %159 = vector.broadcast %cst_51 : f32 to vector<8x128xf32>
    %c0_i32 = arith.constant 0 : i32
    %160 = vector.broadcast %c0_i32 : i32 to vector<8x128xi32>
    %161 = arith.cmpi eq, %157, %160 : vector<8x128xi32>
    %c0_i32_52 = arith.constant 0 : i32
    %162 = vector.broadcast %c0_i32_52 : i32 to vector<8x128xi32>
    %163 = arith.cmpi eq, %158, %162 : vector<8x128xi32>
    %164 = arith.andi %161, %163 : vector<8x128xi1>
    %cst_53 = arith.constant 0.000000e+00 : f32
    %165 = vector.shape_cast %63 : vector<1x1xf32> to vector<1x1xf32>
    %166 = vector.broadcast %165 : vector<1x1xf32> to vector<8x128xf32>
    %167 = vector.broadcast %cst_53 : f32 to vector<8x128xf32>
    %168 = arith.select %164, %166, %167 : vector<8x128xi1>, vector<8x128xf32>
    %169 = arith.addf %159, %168 : vector<8x128xf32>
    %c1_i32 = arith.constant 1 : i32
    %170 = vector.broadcast %c1_i32 : i32 to vector<8x128xi32>
    %171 = arith.cmpi eq, %157, %170 : vector<8x128xi32>
    %c0_i32_54 = arith.constant 0 : i32
    %172 = vector.broadcast %c0_i32_54 : i32 to vector<8x128xi32>
    %173 = arith.cmpi eq, %158, %172 : vector<8x128xi32>
    %174 = arith.andi %171, %173 : vector<8x128xi1>
    %cst_55 = arith.constant 0.000000e+00 : f32
    %175 = vector.shape_cast %70 : vector<1x1xf32> to vector<1x1xf32>
    %176 = vector.broadcast %175 : vector<1x1xf32> to vector<8x128xf32>
    %177 = vector.broadcast %cst_55 : f32 to vector<8x128xf32>
    %178 = arith.select %174, %176, %177 : vector<8x128xi1>, vector<8x128xf32>
    %179 = arith.addf %169, %178 : vector<8x128xf32>
    %c0_i32_56 = arith.constant 0 : i32
    %180 = vector.broadcast %c0_i32_56 : i32 to vector<8x128xi32>
    %181 = arith.cmpi eq, %157, %180 : vector<8x128xi32>
    %c1_i32_57 = arith.constant 1 : i32
    %182 = vector.broadcast %c1_i32_57 : i32 to vector<8x128xi32>
    %183 = arith.cmpi eq, %158, %182 : vector<8x128xi32>
    %184 = arith.andi %181, %183 : vector<8x128xi1>
    %cst_58 = arith.constant 0.000000e+00 : f32
    %185 = vector.shape_cast %106 : vector<1x1xf32> to vector<1x1xf32>
    %186 = vector.broadcast %185 : vector<1x1xf32> to vector<8x128xf32>
    %187 = vector.broadcast %cst_58 : f32 to vector<8x128xf32>
    %188 = arith.select %184, %186, %187 : vector<8x128xi1>, vector<8x128xf32>
    %189 = arith.addf %179, %188 : vector<8x128xf32>
    %c1_i32_59 = arith.constant 1 : i32
    %190 = vector.broadcast %c1_i32_59 : i32 to vector<8x128xi32>
    %191 = arith.cmpi eq, %157, %190 : vector<8x128xi32>
    %c1_i32_60 = arith.constant 1 : i32
    %192 = vector.broadcast %c1_i32_60 : i32 to vector<8x128xi32>
    %193 = arith.cmpi eq, %158, %192 : vector<8x128xi32>
    %194 = arith.andi %191, %193 : vector<8x128xi1>
    %cst_61 = arith.constant 0.000000e+00 : f32
    %195 = vector.shape_cast %113 : vector<1x1xf32> to vector<1x1xf32>
    %196 = vector.broadcast %195 : vector<1x1xf32> to vector<8x128xf32>
    %197 = vector.broadcast %cst_61 : f32 to vector<8x128xf32>
    %198 = arith.select %194, %196, %197 : vector<8x128xi1>, vector<8x128xf32>
    %199 = arith.addf %189, %198 : vector<8x128xf32>
    %c0_i32_62 = arith.constant 0 : i32
    %200 = vector.broadcast %c0_i32_62 : i32 to vector<8x128xi32>
    %201 = arith.cmpi eq, %157, %200 : vector<8x128xi32>
    %c2_i32 = arith.constant 2 : i32
    %202 = vector.broadcast %c2_i32 : i32 to vector<8x128xi32>
    %203 = arith.cmpi eq, %158, %202 : vector<8x128xi32>
    %204 = arith.andi %201, %203 : vector<8x128xi1>
    %cst_63 = arith.constant 0.000000e+00 : f32
    %205 = vector.shape_cast %149 : vector<1x1xf32> to vector<1x1xf32>
    %206 = vector.broadcast %205 : vector<1x1xf32> to vector<8x128xf32>
    %207 = vector.broadcast %cst_63 : f32 to vector<8x128xf32>
    %208 = arith.select %204, %206, %207 : vector<8x128xi1>, vector<8x128xf32>
    %209 = arith.addf %199, %208 : vector<8x128xf32>
    %c1_i32_64 = arith.constant 1 : i32
    %210 = vector.broadcast %c1_i32_64 : i32 to vector<8x128xi32>
    %211 = arith.cmpi eq, %157, %210 : vector<8x128xi32>
    %c2_i32_65 = arith.constant 2 : i32
    %212 = vector.broadcast %c2_i32_65 : i32 to vector<8x128xi32>
    %213 = arith.cmpi eq, %158, %212 : vector<8x128xi32>
    %214 = arith.andi %211, %213 : vector<8x128xi1>
    %cst_66 = arith.constant 0.000000e+00 : f32
    %215 = vector.shape_cast %156 : vector<1x1xf32> to vector<1x1xf32>
    %216 = vector.broadcast %215 : vector<1x1xf32> to vector<8x128xf32>
    %217 = vector.broadcast %cst_66 : f32 to vector<8x128xf32>
    %218 = arith.select %214, %216, %217 : vector<8x128xi1>, vector<8x128xf32>
    %219 = arith.addf %209, %218 : vector<8x128xf32>
    %220 = vector.shape_cast %219 : vector<8x128xf32> to vector<1x8x128xf32>
    %c0_67 = arith.constant 0 : index
    %c0_68 = arith.constant 0 : index
    %c0_69 = arith.constant 0 : index
    %221 = vector.load %arg8[%c0_67, %c0_68, %c0_69] : memref<1x8x128xf32, #tpu.memory_space<vmem>>, vector<1x8x128xf32>
    tpu.vector_store %arg8[%c0_67, %c0_68, %c0_69], %220 {strides = array<i32>} : memref<1x8x128xf32, #tpu.memory_space<vmem>>, vector<1x8x128xf32>,
    return
  }
  func.func @transform_0(%arg0: i32) -> (i32, i32) {
    %c0_i32 = arith.constant 0 : i32
    %c0_i32_0 = arith.constant 0 : i32
    return %arg0, %c0_i32 : i32, i32
  }
  func.func @transform_1(%arg0: i32) -> (i32, i32) {
    %c0_i32 = arith.constant 0 : i32
    %c0_i32_0 = arith.constant 0 : i32
    return %arg0, %c0_i32 : i32, i32
  }
  func.func @transform_2(%arg0: i32) -> (i32, i32) {
    %c0_i32 = arith.constant 0 : i32
    %c0_i32_0 = arith.constant 0 : i32
    %c0_i32_1 = arith.constant 0 : i32
    return %c0_i32, %c0_i32_0 : i32, i32
  }
  func.func @transform_3(%arg0: i32) -> (i32, i32) {
    %c0_i32 = arith.constant 0 : i32
    %c0_i32_0 = arith.constant 0 : i32
    return %arg0, %c0_i32 : i32, i32
  }
  func.func @transform_4(%arg0: i32) -> (i32, i32) {
    %c0_i32 = arith.constant 0 : i32
    %c0_i32_0 = arith.constant 0 : i32
    return %arg0, %c0_i32 : i32, i32
  }
  func.func @transform_5(%arg0: i32) -> (i32, i32) {
    %c0_i32 = arith.constant 0 : i32
    %c0_i32_0 = arith.constant 0 : i32
    return %arg0, %c0_i32 : i32, i32
  }
  func.func @transform_6(%arg0: i32) -> (i32, i32) {
    %c0_i32 = arith.constant 0 : i32
    %c0_i32_0 = arith.constant 0 : i32
    %c0_i32_1 = arith.constant 0 : i32
    return %c0_i32, %c0_i32_0 : i32, i32
  }
  func.func @transform_7(%arg0: i32) -> (i32, i32, i32) {
    %c0_i32 = arith.constant 0 : i32
    %c0_i32_0 = arith.constant 0 : i32
    %c0_i32_1 = arith.constant 0 : i32
    return %arg0, %c0_i32, %c0_i32_0 : i32, i32, i32
  }
}

</mosaic_0001>

<bundles_post_ra>
// kernel: tpu_custom_call.1
= control target key start
LH: loop header
LB: loop body
LE: loop exit
PB: predicated region body
PF: predicated region fallthrough
CT: control target
= control target key end

     0   :  { %12 = vsyncpa [#allocation3], 0  ;;  %s744_s0 = inlined_call_operand.vmem [shape: f32[8,128], index: 0, kind: input, shape index: {}]   ;;  %s745_s1 = inlined_call_operand.vmem [shape: f32[8,128], index: 1, kind: input, shape index: {}]   ;;  %s746_s2 = inlined_call_operand.hbm [shape: bf16[128,128], index: 2, kind: input, shape index: {}]   ;;  %s747_s3 = inlined_call_operand.vmem [shape: f32[8,3], index: 3, kind: input, shape index: {}]   ;;  %s748_s4 = inlined_call_operand.vmem [shape: f32[8,3], index: 4, kind: input, shape index: {}]   ;;  %s749_s5 = inlined_call_operand.vmem [shape: f32[8,1], index: 5, kind: input, shape index: {}]   ;;  %s750_s6 = inlined_call_operand.vmem [shape: f32[1,128], index: 6, kind: input, shape index: {}]   ;;  %s751_s7 = inlined_call_operand.hbm [shape: f32[1,8,128], index: 7, kind: output, shape index: {}]  }
   0x1   :  { %13 = vsyncpa [#allocation4], 0  ;;  %s559_s24 = smov [#allocation2]   ;;  %s511_s28 = scalar_lea.hbm %s746_s2, 1024 }
   0x2   :  { %s23_s25 = sshll.u32 %s559_s24, 4  ;;  %p512_p0 = scmp.ne.s32.totalorder %s746_s2, %s511_s28  ;;  %s24_s25 = int_to_ptr.vmem [resolvable:$true] %s23_s25 }
   0x3   :  { %p515_p1 = scmp.lt.u32.totalorder %s511_s28, %s746_s2 }
   0x5   :  { %p517_p2 = pnand %p515_p1, %p512_p0 }
   0x7   :  { %520 = shalt.err (!%p517_p2)
}
   0x8   :  { %s521_s10 = scalar_lea.vmem %s24_s25, 1024  ;;  %p526_p4 = scmp.lt.s32.totalorder %s24_s25, %s24_s25 }
   0x9   :  { %p522_p3 = scmp.ne.s32.totalorder %s24_s25, %s521_s10  ;;  %p527_p5 = scmp.lt.s32.totalorder %s521_s10, %s521_s10 }
   0xb   :  { %p528_p6 = por %p527_p5, %p526_p4 }
   0xd   :  { %p529_p7 = pnand %p528_p6, %p522_p3 }
   0xf   :  { %532 = shalt.err (!%p529_p7)
}
  0x10   :  { %s560_s11 = smov 64   ;;  %s561_s12 = smov 4  }
  0x11   :  { %29 = dma.hbm_to_vmem [thread:$0]  %s746_s2, 1024, %s24_s25, [#allocation3], %s560_s11, %s560_s11, %s561_s12  }
  0x12   :  { %555 = dma.done.wait [#allocation3], 1024  }
  0x13   :  { %556 = vsyncadd [#allocation3], 4294966272  ;;  %v562_v0 = vmov 0.0   ;;  %vm563_vm0 = vmmov 0   ;;  %v564_v1 = vmov 1   ;;  %v481_v2 = vld [vmem:[#allocation2] sm:$0xff]   ;;  %v155_v15 = vlaneseq }
  0x14   :  { %431 = vmatprep.subr.bf16.mxu0 %v562_v0  ;;  %447 = vmatprep.mubr.msk.bf16.mxu0 %vm563_vm0, %v562_v0  ;;  %v482_v3 = vld [vmem:[#allocation2 + $0x8] sm:$0xff]   ;;  %v483_v4 = vld [vmem:[#allocation2 + $0x10] sm:$0xff]   ;;  %v164_v5 = vld [vmem:[%s748_s4] sm:$0xff]  ;;  %v565_v14 = vmov 2   ;;  %v566_v19 = vmov 0   ;;  %vm568_vm4 = vmmov 1  }
  0x15   :  { %477 = vset.pattern.permute.xlu1 %v564_v1  ;;  %432 = vmatpush3.bf16.msra.mxu0 %v481_v2  ;;  %489 = vrcp.f32 %v164_v5  ;;  %v484_v6 = vld [vmem:[#allocation2 + $0x18] sm:$0xff]   ;;  %v485_v7 = vld [vmem:[#allocation2 + $0x20] sm:$0xff]   ;;  %v486_v8 = vld [vmem:[#allocation2 + $0x28] sm:$0xff]   ;;  %v644_v17 = vshrl.u32 %v155_v15, 7  ;;  %s569_s22 = smov 1   ;;  %s571_s23 = smov 126  }
  0x16   :  { %433 = vmatprep.subr.bf16.mxu0 %v562_v0  ;;  %v487_v10 = vld [vmem:[#allocation2 + $0x30] sm:$0xff]   ;;  %v488_v11 = vld [vmem:[#allocation2 + $0x38] sm:$0xff]   ;;  %v42_v12 = vld [vmem:[%s744_s0] sm:$0xff]  ;;  %478 = vset.pattern.permute.xlu0 %v565_v14  ;;  %s572_s30 = smov [#allocation5]  }
  0x17   :  { %v47_v13 = vpack.c.bf16 %v42_v12, %v42_v12  ;;  %v152_v16 = vld [vmem:[%s750_s6] sm:$0x1]  ;;  %v157_v18 = vsub.s32 0, %v644_v17  ;;  %s402_s8 = sshll.u32 %s572_s30, 4  ;;  %s403_s8 = int_to_ptr.vmem [resolvable:$true] %s402_s8 }
  0x18   :  { %vm153_vm1 = vcmp.gt.f32.partialorder %v152_v16, 0.5  ;;  %v43_v22 = vld [vmem:[%s745_s1] sm:$0xff]  ;;  %s567_s1 = smov 127   ;;  %s533_s9 = scalar_lea.vmem %s403_s8, 128 }
  0x19   :  { %434 = vmatpush3.bf16.msra.mxu0 %v482_v3  ;;  %v154_v20 = vsel %vm153_vm1, 1, %v566_v19  ;;  %v44_v27 = vmul.f32 %v43_v22, %v42_v12  ;;  %v653_v31 = vld [vmem:[%s747_s3] sm:$0xff]  ;;  %p534_p8 = scmp.ne.s32.totalorder %s403_s8, %s533_s9  ;;  %p538_p9 = scmp.lt.s32.totalorder %s403_s8, %s403_s8 }
  0x1a   :  { %435 = vmatprep.subr.bf16.mxu0 %v562_v0  ;;  %v158_v21 = vrot.slane %v154_v20, %v157_v18  ;;  %vm167_vm3 = vcmp.gt.f32.partialorder %v653_v31, 0.5  ;;  %v672_v38 = vld [vmem:[%s749_s5] sm:$0xff]  ;;  %s570_s5 = smov 2   ;;  %p539_p10 = scmp.lt.s32.totalorder %s533_s9, %s533_s9 }
  0x1b   :  { %v293_v36 = vsel %vm167_vm3, 1, %v566_v19  ;;  %vm245_vm5 = vmxor %vm167_vm3, %vm568_vm4  ;;  %vm166_vm6 = vcmp.gt.f32.partialorder %v672_v38, 0.5 }
  0x1c   :  { %vm159_vm2 = vcmp.eq.s32.totalorder %v158_v21, 1  ;;  %v246_v37 = vsel %vm245_vm5, 1, %v566_v19  ;;  %v253_v39 = vsel %vm166_vm6, 1, %v566_v19  ;;  %p540_p11 = por %p539_p10, %p538_p9 }
  0x1d   :  { %436 = vmatpush3.bf16.msra.mxu0 %v483_v4 }
  0x1e   :  { %437 = vmatprep.subr.bf16.mxu0 %v562_v0  ;;  %p541_p12 = pnand %p540_p11, %p534_p8 }
  0x1f   :  { %v490_v9 = vpop.eup %489 }
  0x20   :  { %228 = vperm.xlu1 %477, %v490_v9  }
  0x21   :  { %438 = vmatpush3.bf16.msra.mxu0 %v484_v6 }
  0x22   :  { %439 = vmatprep.subr.bf16.mxu0 %v562_v0 }
  0x25   :  { %440 = vmatpush3.bf16.msra.mxu0 %v485_v7 }
  0x26   :  { %441 = vmatprep.subr.bf16.mxu0 %v562_v0 }
  0x29   :  { %442 = vmatpush3.bf16.msra.mxu0 %v486_v8 }
  0x2a   :  { %443 = vmatprep.subr.bf16.mxu0 %v562_v0 }
  0x2d   :  { %444 = vmatpush3.bf16.msra.mxu0 %v487_v10 }
  0x2e   :  { %445 = vmatprep.subr.bf16.mxu0 %v562_v0 }
  0x31   :  { %446 = vmatpush3.bf16.msra.mxu0 %v488_v11 }
  0x34   :  { %448 = vmatmul.mubr.bf16.vlgmr.msra.gmra.mrb[0].mxu0 %v47_v13 }
  0x9f   :  { %v229_v40 = vpop.permute.xlu1 %228 }
 0x107   :  { %v146_v23 = vpop.f32.mrb[0].mxu0 }
 0x108   :  { %v160_v24 = vsel %vm159_vm2, %v146_v23, -1e+30  ;;  %v449_v25 = vpop.f32.mrb[1].mxu0 }
 0x109   :  { %161 = vmax.xlane.f32.xlu0 %v160_v24  ;;  %v149_v26 = vpop.f32.mrb[2].mxu0  ;;  %v231_v41 = vmul.f32 %v229_v40, %v160_v24 }
 0x10a   :  { %v450_v28 = vpop.f32.mrb[3].mxu0 }
 0x10d   :  { %45 = vadd.xlane.f32.xlu0 %v44_v27 }
 0x123   :  { %299 = vperm.xlu0 %478, %v490_v9  }
 0x196   :  { %v162_v29 = vpop.xlane.xlu0 %161 }
 0x197   :  { %v170_v30 = vmul.f32 %v490_v9, %v162_v29 }
 0x199   :  { %234 = vperm.xlu1 %477, %v170_v30  }
 0x19a   :  { %v46_v32 = vpop.xlane.xlu0 %45 }
 0x19b   :  { %v655_v33 = vmul.f32 %v490_v9, %v46_v32 }
 0x19d   :  { %v659_v34 = vmax.f32 %v170_v30, %v655_v33  ;;  %479 = vset.pattern.permute.xlu1 %v565_v14 }
 0x19e   :  { %304 = vperm.xlu1 %479, %v170_v30  }
 0x19f   :  { %v189_v35 = vsub.f32 %v655_v33, %v659_v34 }
 0x1a1   :  { %v190_v23 = vmul.f32 1.442695, %v189_v35 }
 0x1a2   :  { %294 = vrot.lane.b32.xlu1 %v293_v36, %s567_s1  ;;  %v300_v43 = vpop.permute.xlu0 %299 }
 0x1a3   :  { %480 = vset.pattern.permute.xlu1 %v566_v19  ;;  %v302_v46 = vmul.f32 %v300_v43, %v160_v24 }
 0x1a6   :  { %175 = vperm.xlu1 %480, %v490_v9  }
 0x1aa   :  { %247 = vrot.lane.b32.xlu1 %v246_v37, %s569_s22 }
 0x1ae   :  { %181 = vperm.xlu1 %480, %v659_v34  }
 0x1b2   :  { %254 = vrot.lane.b32.xlu1 %v253_v39, %s569_s22 }
 0x218   :  { %v235_v42 = vpop.permute.xlu1 %234 }
 0x219   :  { %v237_v44 = vsub.f32 %v231_v41, %v235_v42 }
 0x21b   :  { %v238_v45 = vmul.f32 1.442695, %v237_v44 }
 0x21d   :  { %491 = vpow2.f32 %v238_v45  ;;  %v305_v47 = vpop.permute.xlu1 %304 }
 0x21e   :  { %v307_v48 = vsub.f32 %v302_v46, %v305_v47 }
 0x220   :  { %v308_v49 = vmul.f32 1.442695, %v307_v48 }
 0x221   :  { %v295_v52 = vpop.permute.xlu1 %294 }
 0x222   :  { %493 = vpow2.f32 %v308_v49  ;;  %vm296_vm7 = vcmp.ne.s32.totalorder %v295_v52, 0 }
 0x223   :  { %vm297_vm8 = vmor %vm167_vm3, %vm296_vm7 }
 0x224   :  { %vm315_vm9 = vmxor %vm297_vm8, %vm568_vm4 }
 0x225   :  { %v316_v53 = vsel %vm315_vm9, 1, %v566_v19  ;;  %v176_v54 = vpop.permute.xlu1 %175  ;;  %vm204_vm9 = vcmask 7168  }
 0x226   :  { %v178_v57 = vmul.f32 %v176_v54, %v160_v24 }
 0x227   :  { %v492_v50 = vpop.eup %491 }
 0x228   :  { %240 = vadd.xlane.f32.xlu1 %v492_v50 }
 0x229   :  { %v248_v55 = vpop.permute.xlu1 %247 }
 0x22a   :  { %vm249_vm10 = vcmp.ne.s32.totalorder %v248_v55, 0 }
 0x22b   :  { %vm250_vm11 = vmor %vm167_vm3, %vm249_vm10 }
 0x22c   :  { %v494_v51 = vpop.eup %493 }
 0x22d   :  { %310 = vadd.xlane.f32.xlu0 %v494_v51  ;;  %v182_v56 = vpop.permute.xlu1 %181 }
 0x22e   :  { %v184_v58 = vsub.f32 %v178_v57, %v182_v56 }
 0x230   :  { %v185_v59 = vmul.f32 1.442695, %v184_v58 }
 0x231   :  { %v255_v61 = vpop.permute.xlu1 %254 }
 0x232   :  { %495 = vpow2.f32 %v185_v59  ;;  %vm256_vm14 = vcmp.ne.s32.totalorder %v255_v61, 0 }
 0x239   :  { %317 = vrot.lane.b32.xlu1 %v316_v53, %s570_s5 }
 0x23c   :  { %v496_v60 = vpop.eup %495 }
 0x243   :  { %323 = vrot.lane.b32.xlu0 %v253_v39, %s570_s5 }
 0x25d   :  { %187 = vadd.xlane.f32.xlu1 %v496_v60 }
 0x2b5   :  { %v241_v62 = vpop.xlane.xlu1 %240 }
 0x2b6   :  { %497 = vrcp.f32 %v241_v62  ;;  %v242_v2 = vsel %vm167_vm3, %v241_v62, 0.0 }
 0x2b9   :  { %v318_v3 = vpop.permute.xlu1 %317 }
 0x2ba   :  { %v311_v63 = vpop.xlane.xlu0 %310  ;;  %vm319_vm13 = vcmp.ne.s32.totalorder %v318_v3, 0 }
 0x2bb   :  { %499 = vrcp.f32 %v311_v63  ;;  %v312_v7 = vsel %vm167_vm3, %v311_v63, 0.0  ;;  %vm320_vm1 = vmor %vm167_vm3, %vm319_vm13 }
 0x2be   :  { %v324_v5 = vpop.permute.xlu0 %323 }
 0x2bf   :  { %vm325_vm2 = vcmp.ne.s32.totalorder %v324_v5, 0 }
 0x2c0   :  { %v498_v1 = vpop.eup %497 }
 0x2c1   :  { %v244_v4 = vmul.f32 %v498_v1, %v242_v2 }
 0x2c3   :  { %vm251_vm12 = vcmp.gt.f32.partialorder %v244_v4, 1e-07 }
 0x2c4   :  { %vm252_vm15 = vmand %vm250_vm11, %vm251_vm12  ;;  %vm372_vm11 = vcmp.eq.s32.totalorder %v644_v17, 1 }
 0x2c5   :  { %v500_v6 = vpop.eup %499  ;;  %vm687_vm0 = vmand %vm252_vm15, %vm256_vm14 }
 0x2c6   :  { %v314_v9 = vmul.f32 %v500_v6, %v312_v7  ;;  %v258_v10 = vsel %vm687_vm0, %v244_v4, 1.0  ;;  %v420_v11 = vsel %vm687_vm0, 1.0, %v562_v0 }
 0x2c7   :  { %501 = vlog2.f32 %v258_v10  ;;  %280 = vrot.lane.b32.xlu0 %v420_v11, %s567_s1 }
 0x2c8   :  { %vm321_vm4 = vcmp.gt.f32.partialorder %v314_v9, 1e-07 }
 0x2c9   :  { %vm322_vm5 = vmand %vm320_vm1, %vm321_vm4 }
 0x2ca   :  { %vm326_vm7 = vmand %vm322_vm5, %vm325_vm2 }
 0x2cb   :  { %v327_v12 = vsel %vm326_vm7, %v314_v9, 1.0  ;;  %v421_v24 = vsel %vm326_vm7, 1.0, %v562_v0 }
 0x2cc   :  { %503 = vlog2.f32 %v327_v12 }
 0x2cd   :  { %505 = vpow2.f32 %v190_v23 }
 0x2d1   :  { %v502_v13 = vpop.eup %501 }
 0x2d2   :  { %v260_v14 = vmul.f32 0.6931472, %v502_v13 }
 0x2d4   :  { %v261_v16 = vsub.f32 0.0, %v260_v14 }
 0x2d6   :  { %v504_v18 = vpop.eup %503  ;;  %v262_v19 = vsel %vm687_vm0, %v261_v16, 0.0 }
 0x2d7   :  { %264 = vrot.lane.b32.xlu0 %v262_v19, %s567_s1  ;;  %v329_v20 = vmul.f32 0.6931472, %v504_v18  ;;  %v506_v25 = vpop.eup %505 }
 0x2d9   :  { %v330_v21 = vsub.f32 0.0, %v329_v20 }
 0x2db   :  { %v331_v22 = vsel %vm326_vm7, %v330_v21, 0.0 }
 0x2dc   :  { %333 = vrot.lane.b32.xlu0 %v331_v22, %s571_s23 }
 0x2e0   :  { %349 = vrot.lane.b32.xlu0 %v421_v24, %s571_s23 }
 0x2ea   :  { %v188_v26 = vpop.xlane.xlu1 %187 }
 0x2eb   :  { %v194_v27 = vadd.f32 %v506_v25, %v188_v26  ;;  %v192_v28 = vsel %vm167_vm3, %v188_v26, 0.0  ;;  %vm366_vm3 = vcmp.eq.s32.totalorder %v644_v17, 0 }
 0x2ec   :  { %v193_v29 = vadd.f32 %v506_v25, %v192_v28  ;;  %v365_v28 = vand.u32 127, %v155_v15 }
 0x2ed   :  { %507 = vrcp.f32 %v194_v27 }
 0x2ee   :  { %vm377_vm14 = vcmp.eq.s32.totalorder %v365_v28, 1  ;;  %vm386_vm0 = vcmp.eq.s32.totalorder %v365_v28, 2 }
 0x2ef   :  { %vm378_vm15 = vmand %vm366_vm3, %vm377_vm14 }
 0x2f0   :  { %vm382_vm1 = vmand %vm372_vm11, %vm377_vm14 }
 0x2f1   :  { %vm387_vm2 = vmand %vm366_vm3, %vm386_vm0 }
 0x2f2   :  { %vm391_vm4 = vmand %vm372_vm11, %vm386_vm0 }
 0x2f7   :  { %v508_v30 = vpop.eup %507 }
 0x2f8   :  { %v196_v32 = vmul.f32 %v508_v30, %v193_v29 }
 0x2fa   :  { %vm197_vm8 = vcmp.gt.f32.partialorder %v196_v32, 1e-07 }
 0x2fb   :  { %vm198_vm10 = vmand %vm197_vm8, %vm166_vm6  ;;  %vm367_vm6 = vcmp.eq.s32.totalorder %v365_v28, 0 }
 0x2fc   :  { %v419_v33 = vsel %vm198_vm10, 1.0, %v562_v0  ;;  %v199_v34 = vsel %vm198_vm10, %v196_v32, 1.0  ;;  %vm368_vm12 = vmand %vm366_vm3, %vm367_vm6 }
 0x2fd   :  { %v217_v35 = vsel %vm204_vm9, %v419_v33, 0.0  ;;  %509 = vlog2.f32 %v199_v34  ;;  %vm373_vm13 = vmand %vm372_vm11, %vm367_vm6 }
 0x2fe   :  { %218 = vadd.xlane.f32.xlu1 %v217_v35 }
 0x307   :  { %v510_v36 = vpop.eup %509 }
 0x308   :  { %v201_v37 = vmul.f32 0.6931472, %v510_v36 }
 0x30a   :  { %v202_v39 = vsub.f32 0.0, %v201_v37 }
 0x30c   :  { %v203_v31 = vsel %vm198_vm10, %v202_v39, 0.0 }
 0x30d   :  { %v205_v40 = vsel %vm204_vm9, %v203_v31, 0.0 }
 0x30e   :  { %206 = vadd.xlane.f32.xlu0 %v205_v40 }
 0x339   :  { %v281_v41 = vpop.permute.xlu0 %280 }
 0x33a   :  { %v283_v42 = vsel %vm204_vm9, %v281_v41, 0.0 }
 0x33b   :  { %284 = vadd.xlane.f32.xlu1 %v283_v42 }
 0x349   :  { %v265_v38 = vpop.permute.xlu0 %264 }
 0x34a   :  { %v267_v43 = vsel %vm204_vm9, %v265_v38, 0.0 }
 0x34b   :  { %268 = vadd.xlane.f32.xlu1 %v267_v43 }
 0x34e   :  { %v334_v0 = vpop.permute.xlu0 %333 }
 0x34f   :  { %v336_v44 = vsel %vm204_vm9, %v334_v0, 0.0 }
 0x350   :  { %337 = vadd.xlane.f32.xlu1 %v336_v44 }
 0x352   :  { %v350_v45 = vpop.permute.xlu0 %349 }
 0x353   :  { %v352_v46 = vsel %vm204_vm9, %v350_v45, 0.0 }
 0x354   :  { %353 = vadd.xlane.f32.xlu1 %v352_v46 }
 0x38b   :  { %v219_v47 = vpop.xlane.xlu1 %218 }
 0x38c   :  { %v220_v48 = vrot.slane %v219_v47, 4 }
 0x38e   :  { %v221_v49 = vadd.f32 %v220_v48, %v219_v47 }
 0x390   :  { %v222_v50 = vrot.slane %v221_v49, 2 }
 0x392   :  { %v223_v54 = vadd.f32 %v222_v50, %v221_v49 }
 0x394   :  { %v224_v57 = vrot.slane %v223_v54, 1 }
 0x396   :  { %v225_v60 = vadd.f32 %v224_v57, %v223_v54 }
 0x39b   :  { %v207_v51 = vpop.xlane.xlu0 %206 }
 0x39c   :  { %v208_v52 = vrot.slane %v207_v51, 4 }
 0x39e   :  { %v209_v53 = vadd.f32 %v208_v52, %v207_v51 }
 0x3a0   :  { %v210_v55 = vrot.slane %v209_v53, 2 }
 0x3a2   :  { %v211_v56 = vadd.f32 %v210_v55, %v209_v53 }
 0x3a4   :  { %v212_v58 = vrot.slane %v211_v56, 1 }
 0x3a6   :  { %v213_v59 = vadd.f32 %v212_v58, %v211_v56 }
 0x3a8   :  { %451 = vpush %v213_v59 }
 0x3a9   :  { %453 = vpush %v225_v60 }
 0x3c8   :  { %v285_v61 = vpop.xlane.xlu1 %284 }
 0x3c9   :  { %v286_v62 = vrot.slane %v285_v61, 4 }
 0x3cb   :  { %v287_v63 = vadd.f32 %v286_v62, %v285_v61 }
 0x3cd   :  { %v288_v1 = vrot.slane %v287_v63, 2 }
 0x3cf   :  { %v289_v5 = vadd.f32 %v288_v1, %v287_v63 }
 0x3d1   :  { %v290_v11 = vrot.slane %v289_v5, 1 }
 0x3d3   :  { %v291_v20 = vadd.f32 %v290_v11, %v289_v5 }
 0x3d8   :  { %v269_v2 = vpop.xlane.xlu1 %268 }
 0x3d9   :  { %v270_v3 = vrot.slane %v269_v2, 4  ;;  %s452_s24 = spop %451 }
 0x3da   :  { %s454_s25 = spop %453  ;;  %v369_v29 = vstv %s452_s24 }
 0x3db   :  { %v271_v4 = vadd.f32 %v270_v3, %v269_v2  ;;  %v374_v30 = vstv %s454_s25  ;;  %v370_v32 = vsel %vm368_vm12, %v369_v29, 0.0 }
 0x3dc   :  { %v375_v33 = vsel %vm373_vm13, %v374_v30, 0.0 }
 0x3dd   :  { %v272_v6 = vrot.slane %v271_v4, 2  ;;  %v338_v7 = vpop.xlane.xlu1 %337  ;;  %v376_v15 = vadd.f32 %v375_v33, %v370_v32 }
 0x3de   :  { %v339_v8 = vrot.slane %v338_v7, 4 }
 0x3df   :  { %v273_v9 = vadd.f32 %v272_v6, %v271_v4 }
 0x3e0   :  { %v340_v10 = vadd.f32 %v339_v8, %v338_v7 }
 0x3e1   :  { %v354_v12 = vpop.xlane.xlu1 %353  ;;  %v274_v13 = vrot.slane %v273_v9, 1 }
 0x3e2   :  { %v341_v14 = vrot.slane %v340_v10, 2  ;;  %v355_v16 = vrot.slane %v354_v12, 4 }
 0x3e3   :  { %v275_v18 = vadd.f32 %v274_v13, %v273_v9 }
 0x3e4   :  { %v356_v19 = vadd.f32 %v355_v16, %v354_v12  ;;  %v342_v21 = vadd.f32 %v341_v14, %v340_v10 }
 0x3e5   :  { %455 = vpush %v275_v18 }
 0x3e6   :  { %v357_v22 = vrot.slane %v356_v19, 2  ;;  %457 = vpush %v291_v20  ;;  %v343_v23 = vrot.slane %v342_v21, 1 }
 0x3e8   :  { %v358_v24 = vadd.f32 %v357_v22, %v356_v19  ;;  %v344_v25 = vadd.f32 %v343_v23, %v342_v21 }
 0x3ea   :  { %459 = vpush %v344_v25  ;;  %v359_v26 = vrot.slane %v358_v24, 1 }
 0x3ec   :  { %v360_v27 = vadd.f32 %v359_v26, %v358_v24 }
 0x3ee   :  { %461 = vpush %v360_v27 }
 0x416   :  { %s456_s26 = spop %455 }
 0x417   :  { %v379_v34 = vstv %s456_s26  ;;  %s458_s27 = spop %457 }
 0x418   :  { %v380_v35 = vsel %vm378_vm15, %v379_v34, 0.0  ;;  %v383_v36 = vstv %s458_s27 }
 0x419   :  { %v381_v37 = vadd.f32 %v380_v35, %v376_v15  ;;  %v384_v39 = vsel %vm382_vm1, %v383_v36, 0.0 }
 0x41b   :  { %s460_s28 = spop %459  ;;  %v385_v31 = vadd.f32 %v384_v39, %v381_v37 }
 0x41c   :  { %v388_v40 = vstv %s460_s28 }
 0x41d   :  { %v389_v41 = vsel %vm387_vm2, %v388_v40, 0.0 }
 0x41e   :  { %v390_v42 = vadd.f32 %v389_v41, %v385_v31 }
 0x41f   :  { %s462_s29 = spop %461 }
 0x420   :  { %v392_v38 = vstv %s462_s29 }
 0x421   :  { %v393_v43 = vsel %vm391_vm4, %v392_v38, 0.0 }
 0x422   :  { %v394_v0 = vadd.f32 %v393_v43, %v390_v42 }
 0x424   :  { %395 = vst [vmem:[#allocation5] sm:$0xff] %v394_v0 }
 0x425   :  { %544 = shalt.err (!%p541_p12)
}
 0x426   :  { %s545_s12 = scalar_lea.hbm %s751_s7, 128 }
 0x427   :  { %p546_p13 = scmp.ne.s32.totalorder %s751_s7, %s545_s12  ;;  %p549_p0 = scmp.lt.u32.totalorder %s545_s12, %s751_s7 }
 0x429   :  { %p551_p1 = pnand %p549_p0, %p546_p13 }
 0x42b   :  { %554 = shalt.err (!%p551_p1)
}
 0x42c   :  { %405 = dma.vmem_to_hbm [thread:$0]  %s403_s8, 128, %s751_s7, [#allocation4]  }
 0x42d   :  { %557 = dma.done.wait [#allocation4], 128  }
 0x42e   :  { %558 = vsyncadd [#allocation4], 4294967168 }
 0x42f   :  { %409 = vsyncpa [#allocation3], 1 }
 0x430   :  { %410 = vsyncpa [#allocation4], 1 }

// kernel: tpu_custom_call.1
= control target key start
LH: loop header
LB: loop body
LE: loop exit
PB: predicated region body
PF: predicated region fallthrough
CT: control target
= control target key end

     0   :  { %12 = vsyncpa [#allocation3], 0  ;;  %s744_s0 = inlined_call_operand.vmem [shape: f32[8,128], index: 0, kind: input, shape index: {}]   ;;  %s745_s1 = inlined_call_operand.vmem [shape: f32[8,128], index: 1, kind: input, shape index: {}]   ;;  %s746_s2 = inlined_call_operand.hbm [shape: bf16[128,128], index: 2, kind: input, shape index: {}]   ;;  %s747_s3 = inlined_call_operand.vmem [shape: f32[8,3], index: 3, kind: input, shape index: {}]   ;;  %s748_s4 = inlined_call_operand.vmem [shape: f32[8,3], index: 4, kind: input, shape index: {}]   ;;  %s749_s5 = inlined_call_operand.vmem [shape: f32[8,1], index: 5, kind: input, shape index: {}]   ;;  %s750_s6 = inlined_call_operand.vmem [shape: f32[1,128], index: 6, kind: input, shape index: {}]   ;;  %s751_s7 = inlined_call_operand.hbm [shape: f32[1,8,128], index: 7, kind: output, shape index: {}]  }
   0x1   :  { %13 = vsyncpa [#allocation4], 0  ;;  %s559_s24 = smov [#allocation2]   ;;  %s511_s28 = scalar_lea.hbm %s746_s2, 1024 }
   0x2   :  { %s23_s25 = sshll.u32 %s559_s24, 4  ;;  %p512_p0 = scmp.ne.s32.totalorder %s746_s2, %s511_s28  ;;  %s24_s25 = int_to_ptr.vmem [resolvable:$true] %s23_s25 }
   0x3   :  { %p515_p1 = scmp.lt.u32.totalorder %s511_s28, %s746_s2 }
   0x5   :  { %p517_p2 = pnand %p515_p1, %p512_p0 }
   0x7   :  { %520 = shalt.err (!%p517_p2)
}
   0x8   :  { %s521_s10 = scalar_lea.vmem %s24_s25, 1024  ;;  %p526_p4 = scmp.lt.s32.totalorder %s24_s25, %s24_s25 }
   0x9   :  { %p522_p3 = scmp.ne.s32.totalorder %s24_s25, %s521_s10  ;;  %p527_p5 = scmp.lt.s32.totalorder %s521_s10, %s521_s10 }
   0xb   :  { %p528_p6 = por %p527_p5, %p526_p4 }
   0xd   :  { %p529_p7 = pnand %p528_p6, %p522_p3 }
   0xf   :  { %532 = shalt.err (!%p529_p7)
}
  0x10   :  { %s560_s11 = smov 64   ;;  %s561_s12 = smov 4  }
  0x11   :  { %29 = dma.hbm_to_vmem [thread:$0]  %s746_s2, 1024, %s24_s25, [#allocation3], %s560_s11, %s560_s11, %s561_s12  }
  0x12   :  { %555 = dma.done.wait [#allocation3], 1024  }
  0x13   :  { %556 = vsyncadd [#allocation3], 4294966272  ;;  %v562_v0 = vmov 0.0   ;;  %vm563_vm0 = vmmov 0   ;;  %v564_v1 = vmov 1   ;;  %v481_v2 = vld [vmem:[#allocation2] sm:$0xff]   ;;  %v155_v15 = vlaneseq }
  0x14   :  { %431 = vmatprep.subr.bf16.mxu0 %v562_v0  ;;  %447 = vmatprep.mubr.msk.bf16.mxu0 %vm563_vm0, %v562_v0  ;;  %v482_v3 = vld [vmem:[#allocation2 + $0x8] sm:$0xff]   ;;  %v483_v4 = vld [vmem:[#allocation2 + $0x10] sm:$0xff]   ;;  %v164_v5 = vld [vmem:[%s748_s4] sm:$0xff]  ;;  %v565_v14 = vmov 2   ;;  %v566_v19 = vmov 0   ;;  %vm568_vm4 = vmmov 1  }
  0x15   :  { %477 = vset.pattern.permute.xlu1 %v564_v1  ;;  %432 = vmatpush3.bf16.msra.mxu0 %v481_v2  ;;  %489 = vrcp.f32 %v164_v5  ;;  %v484_v6 = vld [vmem:[#allocation2 + $0x18] sm:$0xff]   ;;  %v485_v7 = vld [vmem:[#allocation2 + $0x20] sm:$0xff]   ;;  %v486_v8 = vld [vmem:[#allocation2 + $0x28] sm:$0xff]   ;;  %v644_v17 = vshrl.u32 %v155_v15, 7  ;;  %s569_s22 = smov 1   ;;  %s571_s23 = smov 126  }
  0x16   :  { %433 = vmatprep.subr.bf16.mxu0 %v562_v0  ;;  %v487_v10 = vld [vmem:[#allocation2 + $0x30] sm:$0xff]   ;;  %v488_v11 = vld [vmem:[#allocation2 + $0x38] sm:$0xff]   ;;  %v42_v12 = vld [vmem:[%s744_s0] sm:$0xff]  ;;  %478 = vset.pattern.permute.xlu0 %v565_v14  ;;  %s572_s30 = smov [#allocation5]  }
  0x17   :  { %v47_v13 = vpack.c.bf16 %v42_v12, %v42_v12  ;;  %v152_v16 = vld [vmem:[%s750_s6] sm:$0x1]  ;;  %v157_v18 = vsub.s32 0, %v644_v17  ;;  %s402_s8 = sshll.u32 %s572_s30, 4  ;;  %s403_s8 = int_to_ptr.vmem [resolvable:$true] %s402_s8 }
  0x18   :  { %vm153_vm1 = vcmp.gt.f32.partialorder %v152_v16, 0.5  ;;  %v43_v22 = vld [vmem:[%s745_s1] sm:$0xff]  ;;  %s567_s1 = smov 127   ;;  %s533_s9 = scalar_lea.vmem %s403_s8, 128 }
  0x19   :  { %434 = vmatpush3.bf16.msra.mxu0 %v482_v3  ;;  %v154_v20 = vsel %vm153_vm1, 1, %v566_v19  ;;  %v44_v27 = vmul.f32 %v43_v22, %v42_v12  ;;  %v653_v31 = vld [vmem:[%s747_s3] sm:$0xff]  ;;  %p534_p8 = scmp.ne.s32.totalorder %s403_s8, %s533_s9  ;;  %p538_p9 = scmp.lt.s32.totalorder %s403_s8, %s403_s8 }
  0x1a   :  { %435 = vmatprep.subr.bf16.mxu0 %v562_v0  ;;  %v158_v21 = vrot.slane %v154_v20, %v157_v18  ;;  %vm167_vm3 = vcmp.gt.f32.partialorder %v653_v31, 0.5  ;;  %v672_v38 = vld [vmem:[%s749_s5] sm:$0xff]  ;;  %s570_s5 = smov 2   ;;  %p539_p10 = scmp.lt.s32.totalorder %s533_s9, %s533_s9 }
  0x1b   :  { %v293_v36 = vsel %vm167_vm3, 1, %v566_v19  ;;  %vm245_vm5 = vmxor %vm167_vm3, %vm568_vm4  ;;  %vm166_vm6 = vcmp.gt.f32.partialorder %v672_v38, 0.5 }
  0x1c   :  { %vm159_vm2 = vcmp.eq.s32.totalorder %v158_v21, 1  ;;  %v246_v37 = vsel %vm245_vm5, 1, %v566_v19  ;;  %v253_v39 = vsel %vm166_vm6, 1, %v566_v19  ;;  %p540_p11 = por %p539_p10, %p538_p9 }
  0x1d   :  { %436 = vmatpush3.bf16.msra.mxu0 %v483_v4 }
  0x1e   :  { %437 = vmatprep.subr.bf16.mxu0 %v562_v0  ;;  %p541_p12 = pnand %p540_p11, %p534_p8 }
  0x1f   :  { %v490_v9 = vpop.eup %489 }
  0x20   :  { %228 = vperm.xlu1 %477, %v490_v9  }
  0x21   :  { %438 = vmatpush3.bf16.msra.mxu0 %v484_v6 }
  0x22   :  { %439 = vmatprep.subr.bf16.mxu0 %v562_v0 }
  0x25   :  { %440 = vmatpush3.bf16.msra.mxu0 %v485_v7 }
  0x26   :  { %441 = vmatprep.subr.bf16.mxu0 %v562_v0 }
  0x29   :  { %442 = vmatpush3.bf16.msra.mxu0 %v486_v8 }
  0x2a   :  { %443 = vmatprep.subr.bf16.mxu0 %v562_v0 }
  0x2d   :  { %444 = vmatpush3.bf16.msra.mxu0 %v487_v10 }
  0x2e   :  { %445 = vmatprep.subr.bf16.mxu0 %v562_v0 }
  0x31   :  { %446 = vmatpush3.bf16.msra.mxu0 %v488_v11 }
  0x34   :  { %448 = vmatmul.mubr.bf16.vlgmr.msra.gmra.mrb[0].mxu0 %v47_v13 }
  0x9f   :  { %v229_v40 = vpop.permute.xlu1 %228 }
 0x107   :  { %v146_v23 = vpop.f32.mrb[0].mxu0 }
 0x108   :  { %v160_v24 = vsel %vm159_vm2, %v146_v23, -1e+30  ;;  %v449_v25 = vpop.f32.mrb[1].mxu0 }
 0x109   :  { %161 = vmax.xlane.f32.xlu0 %v160_v24  ;;  %v149_v26 = vpop.f32.mrb[2].mxu0  ;;  %v231_v41 = vmul.f32 %v229_v40, %v160_v24 }
 0x10a   :  { %v450_v28 = vpop.f32.mrb[3].mxu0 }
 0x10d   :  { %45 = vadd.xlane.f32.xlu0 %v44_v27 }
 0x123   :  { %299 = vperm.xlu0 %478, %v490_v9  }
 0x196   :  { %v162_v29 = vpop.xlane.xlu0 %161 }
 0x197   :  { %v170_v30 = vmul.f32 %v490_v9, %v162_v29 }
 0x199   :  { %234 = vperm.xlu1 %477, %v170_v30  }
 0x19a   :  { %v46_v32 = vpop.xlane.xlu0 %45 }
 0x19b   :  { %v655_v33 = vmul.f32 %v490_v9, %v46_v32 }
 0x19d   :  { %v659_v34 = vmax.f32 %v170_v30, %v655_v33  ;;  %479 = vset.pattern.permute.xlu1 %v565_v14 }
 0x19e   :  { %304 = vperm.xlu1 %479, %v170_v30  }
 0x19f   :  { %v189_v35 = vsub.f32 %v655_v33, %v659_v34 }
 0x1a1   :  { %v190_v23 = vmul.f32 1.442695, %v189_v35 }
 0x1a2   :  { %294 = vrot.lane.b32.xlu1 %v293_v36, %s567_s1  ;;  %v300_v43 = vpop.permute.xlu0 %299 }
 0x1a3   :  { %480 = vset.pattern.permute.xlu1 %v566_v19  ;;  %v302_v46 = vmul.f32 %v300_v43, %v160_v24 }
 0x1a6   :  { %175 = vperm.xlu1 %480, %v490_v9  }
 0x1aa   :  { %247 = vrot.lane.b32.xlu1 %v246_v37, %s569_s22 }
 0x1ae   :  { %181 = vperm.xlu1 %480, %v659_v34  }
 0x1b2   :  { %254 = vrot.lane.b32.xlu1 %v253_v39, %s569_s22 }
 0x218   :  { %v235_v42 = vpop.permute.xlu1 %234 }
 0x219   :  { %v237_v44 = vsub.f32 %v231_v41, %v235_v42 }
 0x21b   :  { %v238_v45 = vmul.f32 1.442695, %v237_v44 }
 0x21d   :  { %491 = vpow2.f32 %v238_v45  ;;  %v305_v47 = vpop.permute.xlu1 %304 }
 0x21e   :  { %v307_v48 = vsub.f32 %v302_v46, %v305_v47 }
 0x220   :  { %v308_v49 = vmul.f32 1.442695, %v307_v48 }
 0x221   :  { %v295_v52 = vpop.permute.xlu1 %294 }
 0x222   :  { %493 = vpow2.f32 %v308_v49  ;;  %vm296_vm7 = vcmp.ne.s32.totalorder %v295_v52, 0 }
 0x223   :  { %vm297_vm8 = vmor %vm167_vm3, %vm296_vm7 }
 0x224   :  { %vm315_vm9 = vmxor %vm297_vm8, %vm568_vm4 }
 0x225   :  { %v316_v53 = vsel %vm315_vm9, 1, %v566_v19  ;;  %v176_v54 = vpop.permute.xlu1 %175  ;;  %vm204_vm9 = vcmask 7168  }
 0x226   :  { %v178_v57 = vmul.f32 %v176_v54, %v160_v24 }
 0x227   :  { %v492_v50 = vpop.eup %491 }
 0x228   :  { %240 = vadd.xlane.f32.xlu1 %v492_v50 }
 0x229   :  { %v248_v55 = vpop.permute.xlu1 %247 }
 0x22a   :  { %vm249_vm10 = vcmp.ne.s32.totalorder %v248_v55, 0 }
 0x22b   :  { %vm250_vm11 = vmor %vm167_vm3, %vm249_vm10 }
 0x22c   :  { %v494_v51 = vpop.eup %493 }
 0x22d   :  { %310 = vadd.xlane.f32.xlu0 %v494_v51  ;;  %v182_v56 = vpop.permute.xlu1 %181 }
 0x22e   :  { %v184_v58 = vsub.f32 %v178_v57, %v182_v56 }
 0x230   :  { %v185_v59 = vmul.f32 1.442695, %v184_v58 }
 0x231   :  { %v255_v61 = vpop.permute.xlu1 %254 }
 0x232   :  { %495 = vpow2.f32 %v185_v59  ;;  %vm256_vm14 = vcmp.ne.s32.totalorder %v255_v61, 0 }
 0x239   :  { %317 = vrot.lane.b32.xlu1 %v316_v53, %s570_s5 }
 0x23c   :  { %v496_v60 = vpop.eup %495 }
 0x243   :  { %323 = vrot.lane.b32.xlu0 %v253_v39, %s570_s5 }
 0x25d   :  { %187 = vadd.xlane.f32.xlu1 %v496_v60 }
 0x2b5   :  { %v241_v62 = vpop.xlane.xlu1 %240 }
 0x2b6   :  { %497 = vrcp.f32 %v241_v62  ;;  %v242_v2 = vsel %vm167_vm3, %v241_v62, 0.0 }
 0x2b9   :  { %v318_v3 = vpop.permute.xlu1 %317 }
 0x2ba   :  { %v311_v63 = vpop.xlane.xlu0 %310  ;;  %vm319_vm13 = vcmp.ne.s32.totalorder %v318_v3, 0 }
 0x2bb   :  { %499 = vrcp.f32 %v311_v63  ;;  %v312_v7 = vsel %vm167_vm3, %v311_v63, 0.0  ;;  %vm320_vm1 = vmor %vm167_vm3, %vm319_vm13 }
 0x2be   :  { %v324_v5 = vpop.permute.xlu0 %323 }
 0x2bf   :  { %vm325_vm2 = vcmp.ne.s32.totalorder %v324_v5, 0 }
 0x2c0   :  { %v498_v1 = vpop.eup %497 }
 0x2c1   :  { %v244_v4 = vmul.f32 %v498_v1, %v242_v2 }
 0x2c3   :  { %vm251_vm12 = vcmp.gt.f32.partialorder %v244_v4, 1e-07 }
 0x2c4   :  { %vm252_vm15 = vmand %vm250_vm11, %vm251_vm12  ;;  %vm372_vm11 = vcmp.eq.s32.totalorder %v644_v17, 1 }
 0x2c5   :  { %v500_v6 = vpop.eup %499  ;;  %vm687_vm0 = vmand %vm252_vm15, %vm256_vm14 }
 0x2c6   :  { %v314_v9 = vmul.f32 %v500_v6, %v312_v7  ;;  %v258_v10 = vsel %vm687_vm0, %v244_v4, 1.0  ;;  %v420_v11 = vsel %vm687_vm0, 1.0, %v562_v0 }
 0x2c7   :  { %501 = vlog2.f32 %v258_v10  ;;  %280 = vrot.lane.b32.xlu0 %v420_v11, %s567_s1 }
 0x2c8   :  { %vm321_vm4 = vcmp.gt.f32.partialorder %v314_v9, 1e-07 }
 0x2c9   :  { %vm322_vm5 = vmand %vm320_vm1, %vm321_vm4 }
 0x2ca   :  { %vm326_vm7 = vmand %vm322_vm5, %vm325_vm2 }
 0x2cb   :  { %v327_v12 = vsel %vm326_vm7, %v314_v9, 1.0  ;;  %v421_v24 = vsel %vm326_vm7, 1.0, %v562_v0 }
 0x2cc   :  { %503 = vlog2.f32 %v327_v12 }
 0x2cd   :  { %505 = vpow2.f32 %v190_v23 }
 0x2d1   :  { %v502_v13 = vpop.eup %501 }
 0x2d2   :  { %v260_v14 = vmul.f32 0.6931472, %v502_v13 }
 0x2d4   :  { %v261_v16 = vsub.f32 0.0, %v260_v14 }
 0x2d6   :  { %v504_v18 = vpop.eup %503  ;;  %v262_v19 = vsel %vm687_vm0, %v261_v16, 0.0 }
 0x2d7   :  { %264 = vrot.lane.b32.xlu0 %v262_v19, %s567_s1  ;;  %v329_v20 = vmul.f32 0.6931472, %v504_v18  ;;  %v506_v25 = vpop.eup %505 }
 0x2d9   :  { %v330_v21 = vsub.f32 0.0, %v329_v20 }
 0x2db   :  { %v331_v22 = vsel %vm326_vm7, %v330_v21, 0.0 }
 0x2dc   :  { %333 = vrot.lane.b32.xlu0 %v331_v22, %s571_s23 }
 0x2e0   :  { %349 = vrot.lane.b32.xlu0 %v421_v24, %s571_s23 }
 0x2ea   :  { %v188_v26 = vpop.xlane.xlu1 %187 }
 0x2eb   :  { %v194_v27 = vadd.f32 %v506_v25, %v188_v26  ;;  %v192_v28 = vsel %vm167_vm3, %v188_v26, 0.0  ;;  %vm366_vm3 = vcmp.eq.s32.totalorder %v644_v17, 0 }
 0x2ec   :  { %v193_v29 = vadd.f32 %v506_v25, %v192_v28  ;;  %v365_v28 = vand.u32 127, %v155_v15 }
 0x2ed   :  { %507 = vrcp.f32 %v194_v27 }
 0x2ee   :  { %vm377_vm14 = vcmp.eq.s32.totalorder %v365_v28, 1  ;;  %vm386_vm0 = vcmp.eq.s32.totalorder %v365_v28, 2 }
 0x2ef   :  { %vm378_vm15 = vmand %vm366_vm3, %vm377_vm14 }
 0x2f0   :  { %vm382_vm1 = vmand %vm372_vm11, %vm377_vm14 }
 0x2f1   :  { %vm387_vm2 = vmand %vm366_vm3, %vm386_vm0 }
 0x2f2   :  { %vm391_vm4 = vmand %vm372_vm11, %vm386_vm0 }
 0x2f7   :  { %v508_v30 = vpop.eup %507 }
 0x2f8   :  { %v196_v32 = vmul.f32 %v508_v30, %v193_v29 }
 0x2fa   :  { %vm197_vm8 = vcmp.gt.f32.partialorder %v196_v32, 1e-07 }
 0x2fb   :  { %vm198_vm10 = vmand %vm197_vm8, %vm166_vm6  ;;  %vm367_vm6 = vcmp.eq.s32.totalorder %v365_v28, 0 }
 0x2fc   :  { %v419_v33 = vsel %vm198_vm10, 1.0, %v562_v0  ;;  %v199_v34 = vsel %vm198_vm10, %v196_v32, 1.0  ;;  %vm368_vm12 = vmand %vm366_vm3, %vm367_vm6 }
 0x2fd   :  { %v217_v35 = vsel %vm204_vm9, %v419_v33, 0.0  ;;  %509 = vlog2.f32 %v199_v34  ;;  %vm373_vm13 = vmand %vm372_vm11, %vm367_vm6 }
 0x2fe   :  { %218 = vadd.xlane.f32.xlu1 %v217_v35 }
 0x307   :  { %v510_v36 = vpop.eup %509 }
 0x308   :  { %v201_v37 = vmul.f32 0.6931472, %v510_v36 }
 0x30a   :  { %v202_v39 = vsub.f32 0.0, %v201_v37 }
 0x30c   :  { %v203_v31 = vsel %vm198_vm10, %v202_v39, 0.0 }
 0x30d   :  { %v205_v40 = vsel %vm204_vm9, %v203_v31, 0.0 }
 0x30e   :  { %206 = vadd.xlane.f32.xlu0 %v205_v40 }
 0x339   :  { %v281_v41 = vpop.permute.xlu0 %280 }
 0x33a   :  { %v283_v42 = vsel %vm204_vm9, %v281_v41, 0.0 }
 0x33b   :  { %284 = vadd.xlane.f32.xlu1 %v283_v42 }
 0x349   :  { %v265_v38 = vpop.permute.xlu0 %264 }
 0x34a   :  { %v267_v43 = vsel %vm204_vm9, %v265_v38, 0.0 }
 0x34b   :  { %268 = vadd.xlane.f32.xlu1 %v267_v43 }
 0x34e   :  { %v334_v0 = vpop.permute.xlu0 %333 }
 0x34f   :  { %v336_v44 = vsel %vm204_vm9, %v334_v0, 0.0 }
 0x350   :  { %337 = vadd.xlane.f32.xlu1 %v336_v44 }
 0x352   :  { %v350_v45 = vpop.permute.xlu0 %349 }
 0x353   :  { %v352_v46 = vsel %vm204_vm9, %v350_v45, 0.0 }
 0x354   :  { %353 = vadd.xlane.f32.xlu1 %v352_v46 }
 0x38b   :  { %v219_v47 = vpop.xlane.xlu1 %218 }
 0x38c   :  { %v220_v48 = vrot.slane %v219_v47, 4 }
 0x38e   :  { %v221_v49 = vadd.f32 %v220_v48, %v219_v47 }
 0x390   :  { %v222_v50 = vrot.slane %v221_v49, 2 }
 0x392   :  { %v223_v54 = vadd.f32 %v222_v50, %v221_v49 }
 0x394   :  { %v224_v57 = vrot.slane %v223_v54, 1 }
 0x396   :  { %v225_v60 = vadd.f32 %v224_v57, %v223_v54 }
 0x39b   :  { %v207_v51 = vpop.xlane.xlu0 %206 }
 0x39c   :  { %v208_v52 = vrot.slane %v207_v51, 4 }
 0x39e   :  { %v209_v53 = vadd.f32 %v208_v52, %v207_v51 }
 0x3a0   :  { %v210_v55 = vrot.slane %v209_v53, 2 }
 0x3a2   :  { %v211_v56 = vadd.f32 %v210_v55, %v209_v53 }
 0x3a4   :  { %v212_v58 = vrot.slane %v211_v56, 1 }
 0x3a6   :  { %v213_v59 = vadd.f32 %v212_v58, %v211_v56 }
 0x3a8   :  { %451 = vpush %v213_v59 }
 0x3a9   :  { %453 = vpush %v225_v60 }
 0x3c8   :  { %v285_v61 = vpop.xlane.xlu1 %284 }
 0x3c9   :  { %v286_v62 = vrot.slane %v285_v61, 4 }
 0x3cb   :  { %v287_v63 = vadd.f32 %v286_v62, %v285_v61 }
 0x3cd   :  { %v288_v1 = vrot.slane %v287_v63, 2 }
 0x3cf   :  { %v289_v5 = vadd.f32 %v288_v1, %v287_v63 }
 0x3d1   :  { %v290_v11 = vrot.slane %v289_v5, 1 }
 0x3d3   :  { %v291_v20 = vadd.f32 %v290_v11, %v289_v5 }
 0x3d8   :  { %v269_v2 = vpop.xlane.xlu1 %268 }
 0x3d9   :  { %v270_v3 = vrot.slane %v269_v2, 4  ;;  %s452_s24 = spop %451 }
 0x3da   :  { %s454_s25 = spop %453  ;;  %v369_v29 = vstv %s452_s24 }
 0x3db   :  { %v271_v4 = vadd.f32 %v270_v3, %v269_v2  ;;  %v374_v30 = vstv %s454_s25  ;;  %v370_v32 = vsel %vm368_vm12, %v369_v29, 0.0 }
 0x3dc   :  { %v375_v33 = vsel %vm373_vm13, %v374_v30, 0.0 }
 0x3dd   :  { %v272_v6 = vrot.slane %v271_v4, 2  ;;  %v338_v7 = vpop.xlane.xlu1 %337  ;;  %v376_v15 = vadd.f32 %v375_v33, %v370_v32 }
 0x3de   :  { %v339_v8 = vrot.slane %v338_v7, 4 }
 0x3df   :  { %v273_v9 = vadd.f32 %v272_v6, %v271_v4 }
 0x3e0   :  { %v340_v10 = vadd.f32 %v339_v8, %v338_v7 }
 0x3e1   :  { %v354_v12 = vpop.xlane.xlu1 %353  ;;  %v274_v13 = vrot.slane %v273_v9, 1 }
 0x3e2   :  { %v341_v14 = vrot.slane %v340_v10, 2  ;;  %v355_v16 = vrot.slane %v354_v12, 4 }
 0x3e3   :  { %v275_v18 = vadd.f32 %v274_v13, %v273_v9 }
 0x3e4   :  { %v356_v19 = vadd.f32 %v355_v16, %v354_v12  ;;  %v342_v21 = vadd.f32 %v341_v14, %v340_v10 }
 0x3e5   :  { %455 = vpush %v275_v18 }
 0x3e6   :  { %v357_v22 = vrot.slane %v356_v19, 2  ;;  %457 = vpush %v291_v20  ;;  %v343_v23 = vrot.slane %v342_v21, 1 }
 0x3e8   :  { %v358_v24 = vadd.f32 %v357_v22, %v356_v19  ;;  %v344_v25 = vadd.f32 %v343_v23, %v342_v21 }
 0x3ea   :  { %459 = vpush %v344_v25  ;;  %v359_v26 = vrot.slane %v358_v24, 1 }
 0x3ec   :  { %v360_v27 = vadd.f32 %v359_v26, %v358_v24 }
 0x3ee   :  { %461 = vpush %v360_v27 }
 0x416   :  { %s456_s26 = spop %455 }
 0x417   :  { %v379_v34 = vstv %s456_s26  ;;  %s458_s27 = spop %457 }
 0x418   :  { %v380_v35 = vsel %vm378_vm15, %v379_v34, 0.0  ;;  %v383_v36 = vstv %s458_s27 }
 0x419   :  { %v381_v37 = vadd.f32 %v380_v35, %v376_v15  ;;  %v384_v39 = vsel %vm382_vm1, %v383_v36, 0.0 }
 0x41b   :  { %s460_s28 = spop %459  ;;  %v385_v31 = vadd.f32 %v384_v39, %v381_v37 }
 0x41c   :  { %v388_v40 = vstv %s460_s28 }
 0x41d   :  { %v389_v41 = vsel %vm387_vm2, %v388_v40, 0.0 }
 0x41e   :  { %v390_v42 = vadd.f32 %v389_v41, %v385_v31 }
 0x41f   :  { %s462_s29 = spop %461 }
 0x420   :  { %v392_v38 = vstv %s462_s29 }
 0x421   :  { %v393_v43 = vsel %vm391_vm4, %v392_v38, 0.0 }
 0x422   :  { %v394_v0 = vadd.f32 %v393_v43, %v390_v42 }
 0x424   :  { %395 = vst [vmem:[#allocation5] sm:$0xff] %v394_v0 }
 0x425   :  { %544 = shalt.err (!%p541_p12)
}
 0x426   :  { %s545_s12 = scalar_lea.hbm %s751_s7, 128 }
 0x427   :  { %p546_p13 = scmp.ne.s32.totalorder %s751_s7, %s545_s12  ;;  %p549_p0 = scmp.lt.u32.totalorder %s545_s12, %s751_s7 }
 0x429   :  { %p551_p1 = pnand %p549_p0, %p546_p13 }
 0x42b   :  { %554 = shalt.err (!%p551_p1)
}
 0x42c   :  { %405 = dma.vmem_to_hbm [thread:$0]  %s403_s8, 128, %s751_s7, [#allocation4]  }
 0x42d   :  { %557 = dma.done.wait [#allocation4], 128  }
 0x42e   :  { %558 = vsyncadd [#allocation4], 4294967168 }
 0x42f   :  { %409 = vsyncpa [#allocation3], 1 }
 0x430   :  { %410 = vsyncpa [#allocation4], 1 }

</bundles_post_ra>
